<compile_context>
chip_gen: v5e
topology: v5e:2x2
jax: 0.10.0
libtpu: 0.0.40
codegen_flags: <defaults>
</compile_context>

<pallas_src>
import jax
import jax.numpy as jnp
from jax.experimental import pallas as pl
from jax.experimental.pallas import tpu as pltpu


def _round_up(x, m):
    return -(-x // m) * m


def actor_kernel(s_ref, w1_ref, b1_ref, w2_ref, b2_ref, w3_ref, b3_ref, a_ref):
    # Layer 1: bf16 MXU matmul (f32 accumulate) + bf16 bias-add / ReLU epilogue.
    s = s_ref[...].astype(jnp.bfloat16)
    h1 = jnp.dot(s, w1_ref[...], preferred_element_type=jnp.float32)
    h1 = jnp.maximum(h1.astype(jnp.bfloat16) + b1_ref[...], 0)

    # Layer 2: same pattern; h1 is already bf16 so it feeds the MXU directly.
    h2 = jnp.dot(h1, w2_ref[...], preferred_element_type=jnp.float32)
    h2 = jnp.maximum(h2.astype(jnp.bfloat16) + b2_ref[...], 0)

    # Layer 3: bias-add + tanh in f32; store only the live action columns
    # (output block is (tb, action_dim), not the 128-padded slab).
    a = jnp.dot(h2, w3_ref[...], preferred_element_type=jnp.float32)
    a = a + b3_ref[...]
    act = a_ref.shape[-1]
    a_ref[...] = jnp.tanh(a[:, :act]).astype(a_ref.dtype)


def prepare_actor_params(w1, b1, w2, b2, w3, b3):
    """Zero-pad feature dims to multiples of 128; weights + layer-1/2 biases
    in bf16, layer-3 bias in f32.

    Inputs follow PyTorch-transposed layout: w (in, out), b (1, out), all f32.
    Zero padding is exact: padded hidden units compute ReLU(0 + 0) = 0 and the
    corresponding padded weight rows contribute nothing to live outputs.
    """
    state_dim, h1 = w1.shape
    _, h2 = w2.shape
    _, act = w3.shape
    h1p, h2p, ap = _round_up(h1, 128), _round_up(h2, 128), _round_up(act, 128)

    def pad2(x, rows, cols):
        r, c = x.shape
        return jnp.pad(x, ((0, rows - r), (0, cols - c)))

    w1p = pad2(w1, state_dim, h1p).astype(jnp.bfloat16)
    w2p = pad2(w2, h1p, h2p).astype(jnp.bfloat16)
    w3p = pad2(w3, h2p, ap).astype(jnp.bfloat16)
    b1p = pad2(b1, 1, h1p).astype(jnp.bfloat16)   # bf16 epilogue (layers 1/2)
    b2p = pad2(b2, 1, h2p).astype(jnp.bfloat16)
    b3p = pad2(b3, 1, ap).astype(jnp.float32)     # f32 epilogue (layer 3)
    return (w1p, b1p, w2p, b2p, w3p, b3p)


def _choose_batch_tile(batch):
    """Pick the batch block size.

    batch <= 512: one block, rounded to a multiple of 16 (bf16 sublane pack).
    Larger: a 128*k tile in [256, 1024] minimizing a simple cost model
      (total padded rows + ~128 "overhead rows" per grid step, the row
      equivalent of the ~0.35us fixed per-step cost), with grid >= 2 so v7x
      can shard batch blocks across both TensorCores.
    """
    if batch <= 512:
        return _round_up(batch, 16)
    OVERHEAD_ROWS = 128
    best_tb, best_key = 256, None
    for k in range(2, 9):                 # tb in {256, ..., 1024}
        tb = 128 * k
        bp = _round_up(batch, tb)
        n_blocks = bp // tb
        if n_blocks < 2:
            continue
        key = (bp + n_blocks * OVERHEAD_ROWS, -tb)
        if best_key is None or key < best_key:
            best_tb, best_key = tb, key
    return best_tb


def actor_forward(s, prepared_params, action_dim):
    """Run the 3-layer actor MLP on a batch of states.

    s: (batch, state_dim) float32
    prepared_params: output of prepare_actor_params
    returns: (batch, action_dim) float32 in (-1, 1)
    """
    w1, b1, w2, b2, w3, b3 = prepared_params
    batch, state_dim = s.shape
    h1p = w1.shape[1]
    h2p = w2.shape[1]
    ap = w3.shape[1]

    tb = _choose_batch_tile(batch)
    bp = _round_up(batch, tb)
    if bp != batch:
        s = jnp.pad(s, ((0, bp - batch), (0, 0)))
    grid = (bp // tb,)

    # Weights/biases: same block every grid step -> DMA'd once, stay in VMEM.
    resident = lambda shape: pl.BlockSpec(shape, lambda i: (0, 0))

    flops = 2 * bp * (state_dim * h1p + h1p * h2p + h2p * ap)
    weight_bytes = 2 * (w1.size + w2.size + w3.size)
    bias_bytes = 2 * (b1.size + b2.size) + 4 * b3.size
    act_bytes = 4 * (bp * state_dim + bp * action_dim)
    cost = pl.CostEstimate(
        flops=flops,
        transcendentals=bp * action_dim,
        bytes_accessed=weight_bytes + bias_bytes + act_bytes,
    )

    out = pl.pallas_call(
        actor_kernel,
        out_shape=jax.ShapeDtypeStruct((bp, action_dim), jnp.float32),
        grid=grid,
        in_specs=[
            pl.BlockSpec((tb, state_dim), lambda i: (i, 0)),
            resident((state_dim, h1p)),
            resident((1, h1p)),
            resident((h1p, h2p)),
            resident((1, h2p)),
            resident((h2p, ap)),
            resident((1, ap)),
        ],
        out_specs=pl.BlockSpec((tb, action_dim), lambda i: (i, 0)),
        compiler_params=pltpu.CompilerParams(
            dimension_semantics=("parallel",),
            vmem_limit_bytes=32 << 20,
        ),
        cost_estimate=cost,
    )(s, w1, b1, w2, b2, w3, b3)

    return out[:batch]


def init_actor_params(key, state_dim, action_dim):
    """Deterministic init mimicking PyTorch nn.Linear (uniform +/- 1/sqrt(fan_in))."""
    def linear(key, fan_in, fan_out):
        kw, kb = jax.random.split(key)
        bound = 1.0 / jnp.sqrt(fan_in)
        w = jax.random.uniform(kw, (fan_in, fan_out), jnp.float32, -bound, bound)
        b = jax.random.uniform(kb, (1, fan_out), jnp.float32, -bound, bound)
        return w, b

    k1, k2, k3 = jax.random.split(key, 3)
    w1, b1 = linear(k1, state_dim, 800)
    w2, b2 = linear(k2, 800, 600)
    w3, b3 = linear(k3, 600, action_dim)
    return w1, b1, w2, b2, w3, b3


def actor_ref_f32(s, w1, b1, w2, b2, w3, b3):
    """Pure-JAX f32 reference (matches the PyTorch module exactly)."""
    h1 = jnp.maximum(s @ w1 + b1, 0.0)
    h2 = jnp.maximum(h1 @ w2 + b2, 0.0)
    return jnp.tanh(h2 @ w3 + b3)


def actor_ref_bf16(s, prepared_params, action_dim):
    """Pure-JAX reference using the same padded bf16 weights + bf16 epilogue."""
    w1, b1, w2, b2, w3, b3 = prepared_params
    h1 = jnp.dot(s.astype(jnp.bfloat16), w1, preferred_element_type=jnp.float32)
    h1 = jnp.maximum(h1.astype(jnp.bfloat16) + b1, 0)
    h2 = jnp.dot(h1, w2, preferred_element_type=jnp.float32)
    h2 = jnp.maximum(h2.astype(jnp.bfloat16) + b2, 0)
    a = jnp.dot(h2, w3, preferred_element_type=jnp.float32) + b3
    return jnp.tanh(a)[:, :action_dim]


if __name__ == "__main__":
    key = jax.random.PRNGKey(0)
    k_params, k_state = jax.random.split(key)

    state_dim = 24      # typical TD3 robot laser-scan state
    action_dim = 2      # (linear vel, angular vel)

    params = init_actor_params(k_params, state_dim, action_dim)
    prepared = prepare_actor_params(*params)

    # 1) Small rollout-style batch (the latency path).
    s_small = jax.random.normal(k_state, (2, state_dim), jnp.float32)
    out_small = jax.block_until_ready(actor_forward(s_small, prepared, action_dim))
    assert out_small.shape == (2, action_dim)
    assert jnp.allclose(out_small, actor_ref_bf16(s_small, prepared, action_dim),
                        atol=2e-2, rtol=2e-2)
    assert jnp.allclose(out_small, actor_ref_f32(s_small, *params),
                        atol=6e-2, rtol=6e-2)

    # 2) Ragged training-style batch (exercises the multi-block grid path).
    s_big = jax.random.normal(jax.random.PRNGKey(1), (600, state_dim), jnp.float32)
    out_big = jax.block_until_ready(actor_forward(s_big, prepared, action_dim))
    assert out_big.shape == (600, action_dim)
    assert jnp.allclose(out_big, actor_ref_bf16(s_big, prepared, action_dim),
                        atol=2e-2, rtol=2e-2)
    assert jnp.allclose(out_big, actor_ref_f32(s_big, *params),
                        atol=6e-2, rtol=6e-2)

    print("KERNEL_OK")
</pallas_src>

<mosaic_0001>
module attributes {stable_mosaic.version = 11 : i64} {
  func.func @actor_kernel(%arg0: i32, %arg1: memref<16x24xf32, #tpu.memory_space<vmem>>, %arg2: memref<24x896xbf16, #tpu.memory_space<vmem>>, %arg3: memref<1x896xbf16, #tpu.memory_space<vmem>>, %arg4: memref<896x640xbf16, #tpu.memory_space<vmem>>, %arg5: memref<1x640xbf16, #tpu.memory_space<vmem>>, %arg6: memref<640x128xbf16, #tpu.memory_space<vmem>>, %arg7: memref<1x128xf32, #tpu.memory_space<vmem>>, %arg8: memref<16x2xf32, #tpu.memory_space<vmem>>) attributes {dimension_semantics = [#tpu.dimension_semantics<parallel>], iteration_bounds = array<i64: 1>, scalar_prefetch = 0 : i64, scratch_operands = 0 : i64, tpu.core_type = #tpu.core_type<tc>, window_params = [{transform_indices = @transform_0, window_bounds = array<i64: 16, 24>}, {pipeline_mode = #tpu.pipeline_mode<synchronous>, transform_indices = @transform_1, window_bounds = array<i64: 24, 896>}, {pipeline_mode = #tpu.pipeline_mode<synchronous>, transform_indices = @transform_2, window_bounds = array<i64: 1, 896>}, {pipeline_mode = #tpu.pipeline_mode<synchronous>, transform_indices = @transform_3, window_bounds = array<i64: 896, 640>}, {pipeline_mode = #tpu.pipeline_mode<synchronous>, transform_indices = @transform_4, window_bounds = array<i64: 1, 640>}, {pipeline_mode = #tpu.pipeline_mode<synchronous>, transform_indices = @transform_5, window_bounds = array<i64: 640, 128>}, {pipeline_mode = #tpu.pipeline_mode<synchronous>, transform_indices = @transform_6, window_bounds = array<i64: 1, 128>}, {transform_indices = @transform_7, window_bounds = array<i64: 16, 2>}]} {
    %c0 = arith.constant 0 : index
    %c0_0 = arith.constant 0 : index
    %0 = vector.load %arg1[%c0, %c0_0] : memref<16x24xf32, #tpu.memory_space<vmem>>, vector<16x24xf32>
    %1 = arith.truncf %0 : vector<16x24xf32> to vector<16x24xbf16>
    %c0_1 = arith.constant 0 : index
    %c0_2 = arith.constant 0 : index
    %2 = vector.load %arg2[%c0_1, %c0_2] : memref<24x896xbf16, #tpu.memory_space<vmem>>, vector<24x896xbf16>
    %cst = arith.constant dense<0.000000e+00> : vector<16x896xf32>
    %3 = tpu.matmul %1, %2, %cst {dimension_numbers = #tpu.dot_dimension_numbers<[1], [0], [0], [1], [0, 0, 1, 1], [], []>} : vector<16x24xbf16>, vector<24x896xbf16>, vector<16x896xf32> -> vector<16x896xf32>
    %4 = arith.truncf %3 : vector<16x896xf32> to vector<16x896xbf16>
    %c0_3 = arith.constant 0 : index
    %c0_4 = arith.constant 0 : index
    %5 = vector.load %arg3[%c0_3, %c0_4] : memref<1x896xbf16, #tpu.memory_space<vmem>>, vector<1x896xbf16>
    %6 = vector.broadcast %5 : vector<1x896xbf16> to vector<16x896xbf16>
    %7 = arith.addf %4, %6 : vector<16x896xbf16>
    %cst_5 = arith.constant 0.000000e+00 : bf16
    %8 = vector.broadcast %cst_5 : bf16 to vector<16x896xbf16>
    %9 = arith.maximumf %7, %8 : vector<16x896xbf16>
    %c0_6 = arith.constant 0 : index
    %c0_7 = arith.constant 0 : index
    %10 = vector.load %arg4[%c0_6, %c0_7] : memref<896x640xbf16, #tpu.memory_space<vmem>>, vector<896x640xbf16>
    %cst_8 = arith.constant dense<0.000000e+00> : vector<16x640xf32>
    %11 = tpu.matmul %9, %10, %cst_8 {dimension_numbers = #tpu.dot_dimension_numbers<[1], [0], [0], [1], [0, 0, 1, 1], [], []>} : vector<16x896xbf16>, vector<896x640xbf16>, vector<16x640xf32> -> vector<16x640xf32>
    %12 = arith.truncf %11 : vector<16x640xf32> to vector<16x640xbf16>
    %c0_9 = arith.constant 0 : index
    %c0_10 = arith.constant 0 : index
    %13 = vector.load %arg5[%c0_9, %c0_10] : memref<1x640xbf16, #tpu.memory_space<vmem>>, vector<1x640xbf16>
    %14 = vector.broadcast %13 : vector<1x640xbf16> to vector<16x640xbf16>
    %15 = arith.addf %12, %14 : vector<16x640xbf16>
    %cst_11 = arith.constant 0.000000e+00 : bf16
    %16 = vector.broadcast %cst_11 : bf16 to vector<16x640xbf16>
    %17 = arith.maximumf %15, %16 : vector<16x640xbf16>
    %c0_12 = arith.constant 0 : index
    %c0_13 = arith.constant 0 : index
    %18 = vector.load %arg6[%c0_12, %c0_13] : memref<640x128xbf16, #tpu.memory_space<vmem>>, vector<640x128xbf16>
    %cst_14 = arith.constant dense<0.000000e+00> : vector<16x128xf32>
    %19 = tpu.matmul %17, %18, %cst_14 {dimension_numbers = #tpu.dot_dimension_numbers<[1], [0], [0], [1], [0, 0, 1, 1], [], []>} : vector<16x640xbf16>, vector<640x128xbf16>, vector<16x128xf32> -> vector<16x128xf32>
    %c0_15 = arith.constant 0 : index
    %c0_16 = arith.constant 0 : index
    %20 = vector.load %arg7[%c0_15, %c0_16] : memref<1x128xf32, #tpu.memory_space<vmem>>, vector<1x128xf32>
    %21 = vector.broadcast %20 : vector<1x128xf32> to vector<16x128xf32>
    %22 = arith.addf %19, %21 : vector<16x128xf32>
    %23 = vector.extract_strided_slice %22 {offsets = [0, 0], sizes = [16, 2], strides = [1, 1]} : vector<16x128xf32> to vector<16x2xf32>
    %24 = math.tanh %23 : vector<16x2xf32>
    %c0_17 = arith.constant 0 : index
    %c0_18 = arith.constant 0 : index
    %25 = vector.load %arg8[%c0_17, %c0_18] : memref<16x2xf32, #tpu.memory_space<vmem>>, vector<16x2xf32>
    tpu.vector_store %arg8[%c0_17, %c0_18], %24 {strides = array<i32>} : memref<16x2xf32, #tpu.memory_space<vmem>>, vector<16x2xf32>,
    return
  }
  func.func @transform_0(%arg0: i32) -> (i32, i32) {
    %c0_i32 = arith.constant 0 : i32
    %c0_i32_0 = arith.constant 0 : i32
    return %arg0, %c0_i32 : i32, i32
  }
  func.func @transform_1(%arg0: i32) -> (i32, i32) {
    %c0_i32 = arith.constant 0 : i32
    %c0_i32_0 = arith.constant 0 : i32
    %c0_i32_1 = arith.constant 0 : i32
    return %c0_i32, %c0_i32_0 : i32, i32
  }
  func.func @transform_2(%arg0: i32) -> (i32, i32) {
    %c0_i32 = arith.constant 0 : i32
    %c0_i32_0 = arith.constant 0 : i32
    %c0_i32_1 = arith.constant 0 : i32
    return %c0_i32, %c0_i32_0 : i32, i32
  }
  func.func @transform_3(%arg0: i32) -> (i32, i32) {
    %c0_i32 = arith.constant 0 : i32
    %c0_i32_0 = arith.constant 0 : i32
    %c0_i32_1 = arith.constant 0 : i32
    return %c0_i32, %c0_i32_0 : i32, i32
  }
  func.func @transform_4(%arg0: i32) -> (i32, i32) {
    %c0_i32 = arith.constant 0 : i32
    %c0_i32_0 = arith.constant 0 : i32
    %c0_i32_1 = arith.constant 0 : i32
    return %c0_i32, %c0_i32_0 : i32, i32
  }
  func.func @transform_5(%arg0: i32) -> (i32, i32) {
    %c0_i32 = arith.constant 0 : i32
    %c0_i32_0 = arith.constant 0 : i32
    %c0_i32_1 = arith.constant 0 : i32
    return %c0_i32, %c0_i32_0 : i32, i32
  }
  func.func @transform_6(%arg0: i32) -> (i32, i32) {
    %c0_i32 = arith.constant 0 : i32
    %c0_i32_0 = arith.constant 0 : i32
    %c0_i32_1 = arith.constant 0 : i32
    return %c0_i32, %c0_i32_0 : i32, i32
  }
  func.func @transform_7(%arg0: i32) -> (i32, i32) {
    %c0_i32 = arith.constant 0 : i32
    %c0_i32_0 = arith.constant 0 : i32
    return %arg0, %c0_i32 : i32, i32
  }
}

</mosaic_0001>

<bundles_post_ra>
// kernel: tpu_custom_call.1
= control target key start
LH: loop header
LB: loop body
LE: loop exit
PB: predicated region body
PF: predicated region fallthrough
CT: control target
= control target key end

     0   :  { %12 = vsyncpa [#allocation3], 0  ;;  %s5268_s0 = inlined_call_operand.hbm [shape: f32[16,24], index: 0, kind: input, shape index: {}]   ;;  %s5269_s1 = inlined_call_operand.hbm [shape: bf16[24,896], index: 1, kind: input, shape index: {}]   ;;  %s5270_s2 = inlined_call_operand.hbm [shape: bf16[1,896], index: 2, kind: input, shape index: {}]   ;;  %s5271_s3 = inlined_call_operand.hbm [shape: bf16[896,640], index: 3, kind: input, shape index: {}]   ;;  %s5272_s4 = inlined_call_operand.hbm [shape: bf16[1,640], index: 4, kind: input, shape index: {}]   ;;  %s5273_s5 = inlined_call_operand.hbm [shape: bf16[640,128], index: 5, kind: input, shape index: {}]   ;;  %s5274_s6 = inlined_call_operand.hbm [shape: f32[1,128], index: 6, kind: input, shape index: {}]   ;;  %s5275_s7 = inlined_call_operand.vmem [shape: f32[16,2], index: 7, kind: output, shape index: {}]  }
   0x1   :  { %13 = vsyncpa [#allocation5], 0 }
   0x2   :  { %14 = vsyncpa [#allocation8], 0  ;;  %s33_s26 = sshll.u32 %s5269_s1, 4  ;;  %s34_s26 = int_to_ptr.hbm [resolvable:$true] %s33_s26 }
   0x3   :  { %15 = vsyncpa [#allocation11], 0  ;;  %s5052_s27 = smov [#allocation4]   ;;  %s57_s8 = sshll.u32 %s5271_s3, 4  ;;  %s58_s8 = int_to_ptr.hbm [resolvable:$true] %s57_s8 }
   0x4   :  { %s35_s28 = sshll.u32 %s5052_s27, 4  ;;  %s5053_s9 = smov 448   ;;  %s36_s28 = int_to_ptr.vmem [resolvable:$true] %s35_s28 }
   0x5   :  { %s5054_s10 = smov 28   ;;  %s5055_s11 = smov [#allocation7]  }
   0x6   :  { %41 = dma.hbm_to_vmem [thread:$0]  %s34_s26, 1344, %s36_s28, [#allocation5], %s5053_s9, %s5053_s9, %s5054_s10  }
   0x7   :  { %s59_s12 = sshll.u32 %s5055_s11, 4  ;;  %s5056_s13 = smov 320   ;;  %s60_s12 = int_to_ptr.vmem [resolvable:$true] %s59_s12 }
   0x8   :  { %s5057_s14 = smov 20   ;;  %s81_s16 = sshll.u32 %s5273_s5, 4  ;;  %s82_s16 = int_to_ptr.hbm [resolvable:$true] %s81_s16 }
   0x9   :  { %65 = dma.hbm_to_vmem [thread:$0]  %s58_s8, 35840, %s60_s12, [#allocation8], %s5056_s13, %s5056_s13, %s5057_s14  }
   0xa   :  { %s5058_s17 = smov [#allocation10]   ;;  %s20_s20 = sshll.u32 %s5268_s0, 4  ;;  %s21_s20 = int_to_ptr.hbm [resolvable:$true] %s20_s20 }
   0xb   :  { %s83_s18 = sshll.u32 %s5058_s17, 4  ;;  %s5059_s21 = smov 64   ;;  %s84_s18 = int_to_ptr.vmem [resolvable:$true] %s83_s18 }
   0xc   :  { %s5060_s22 = smov 4   ;;  %s5061_s23 = smov [#allocation2]  }
   0xd   :  { %89 = dma.hbm_to_vmem [thread:$0]  %s82_s16, 5120, %s84_s18, [#allocation11], %s5059_s21, %s5059_s21, %s5060_s22  }
   0xe   :  { %s22_s24 = sshll.u32 %s5061_s23, 4  ;;  %s5062_s25 = smov 128   ;;  %s23_s24 = int_to_ptr.vmem [resolvable:$true] %s22_s24 }
   0xf   :  { %s5063_s26 = smov 8   ;;  %s47_s28 = sshll.u32 %s5270_s2, 4  ;;  %s48_s28 = int_to_ptr.hbm [resolvable:$true] %s47_s28 }
  0x10   :  { %28 = dma.hbm_to_vmem [thread:$0]  %s21_s20, 256, %s23_s24, [#allocation3], %s5062_s25, %s5062_s25, %s5063_s26  }
  0x11   :  { %s5064_s29 = smov [#allocation6]   ;;  %s71_s9 = sshll.u32 %s5272_s4, 4  ;;  %s72_s9 = int_to_ptr.hbm [resolvable:$true] %s71_s9 }
  0x12   :  { %s49_s30 = sshll.u32 %s5064_s29, 4  ;;  %s5065_s10 = smov [#allocation9]   ;;  %s50_s30 = int_to_ptr.vmem [resolvable:$true] %s49_s30 }
  0x13   :  { %52 = dma.hbm_to_vmem [thread:$0]  %s48_s28, 112, %s50_s30, [#allocation5]  }
  0x14   :  { %s73_s11 = sshll.u32 %s5065_s10, 4  ;;  %s95_s14 = sshll.u32 %s5274_s6, 4  ;;  %s74_s11 = int_to_ptr.vmem [resolvable:$true] %s73_s11  ;;  %s96_s14 = int_to_ptr.hbm [resolvable:$true] %s95_s14 }
  0x15   :  { %76 = dma.hbm_to_vmem [thread:$0]  %s72_s9, 80, %s74_s11, [#allocation8]  }
  0x16   :  { %s5066_s2 = smov [#allocation12]  }
  0x17   :  { %s97_s1 = sshll.u32 %s5066_s2, 4  ;;  %s98_s1 = int_to_ptr.vmem [resolvable:$true] %s97_s1 }
  0x18   :  { %100 = dma.hbm_to_vmem [thread:$0]  %s96_s14, 16, %s98_s1, [#allocation11]  }
  0x19   :  { %5044 = dma.done.wait [#allocation3], 256  }
  0x1a   :  { %5045 = vsyncadd [#allocation3], 4294967040 }
  0x1b   :  { %5046 = dma.done.wait [#allocation5], 1456  }
  0x1c   :  { %5047 = vsyncadd [#allocation5], 4294965840 }
  0x1d   :  { %5048 = dma.done.wait [#allocation8], 35920  }
  0x1e   :  { %5049 = vsyncadd [#allocation8], 4294931376 }
  0x1f   :  { %5050 = dma.done.wait [#allocation11], 5136  }
  0x20   :  { %5051 = vsyncadd [#allocation11], 4294962160  ;;  %v141_v0 = vld [vmem:[#allocation4 + $0x38] sm:$0xff]  ;;  %v142_v1 = vld [vmem:[#allocation4 + $0x40] sm:$0xff]  ;;  %vm203_vm0 = vcmask 1043456   ;;  %vm199_vm1 = vcmask 195584  }
  0x21   :  { %v171_v2 = vunpack.c.l.b16 %v141_v0  ;;  %v172_v3 = vunpack.c.h.b16 %v141_v0  ;;  %v173_v4 = vunpack.c.l.b16 %v142_v1  ;;  %v174_v5 = vunpack.c.h.b16 %v142_v1  ;;  %v3216_v6 = vld [vmem:[#allocation4] sm:$0xf]  ;;  %v4532_v7 = vld [vmem:[#allocation4 + $0x18] sm:$0xf0]  ;;  %v4529_v8 = vld [vmem:[#allocation4 + $0x4] sm:$0xf] }
  0x22   :  { %v3218_v9 = vld [vmem:[#allocation4 + $0x1c] sm:$0xf0]  ;;  %v3224_v14 = vld [vmem:[#allocation4 + $0x8] sm:$0xf]  ;;  %v4533_v15 = vld [vmem:[#allocation4 + $0x20] sm:$0xf0]  ;;  %v3217_v17 = vor.u32 %v4532_v7, %v3216_v6 }
  0x23   :  { %v185_v10 = vpack.c.b16 %v171_v2, %v171_v2  ;;  %v186_v11 = vpack.c.b16 %v172_v3, %v172_v3  ;;  %v187_v12 = vpack.c.b16 %v173_v4, %v173_v4  ;;  %v188_v13 = vpack.c.b16 %v174_v5, %v174_v5  ;;  %v4530_v16 = vld [vmem:[#allocation4 + $0xc] sm:$0xf]  ;;  %v3226_v18 = vld [vmem:[#allocation4 + $0x24] sm:$0xf0]  ;;  %v144_v20 = vld [vmem:[#allocation4 + $0x50] sm:$0xf] }
  0x24   :  { %v143_v19 = vld [vmem:[#allocation4 + $0x48] sm:$0xff]  ;;  %v3221_v25 = vor.u32 %v4529_v8, %v3218_v9  ;;  %v130_v26 = vld [vmem:[#allocation2] sm:$0xff]  ;;  %v131_v27 = vld [vmem:[#allocation2 + $0x8] sm:$0xff]  ;;  %v177_v30 = vunpack.c.l.b16 %v144_v20  ;;  %v3225_v31 = vor.u32 %v4533_v15, %v3224_v14  ;;  %v3229_v32 = vor.u32 %v4530_v16, %v3226_v18 }
  0x25   :  { %v205_v21 = vsel %vm203_vm0, %v185_v10, 0  ;;  %v208_v22 = vsel %vm203_vm0, %v186_v11, 0  ;;  %v211_v23 = vsel %vm203_vm0, %v187_v12, 0  ;;  %v214_v24 = vsel %vm203_vm0, %v188_v13, 0  ;;  %v3232_v33 = vld [vmem:[#allocation4 + $0x10] sm:$0xf] }
  0x26   :  { %231 = vmatpush.bf16.msra.mxu0 %v205_v21  ;;  %245 = vmatpush.bf16.msra.mxu1 %v208_v22  ;;  %v175_v28 = vunpack.c.l.b16 %v143_v19  ;;  %v176_v29 = vunpack.c.h.b16 %v143_v19  ;;  %v191_v36 = vpack.c.b16 %v177_v30, %v177_v30  ;;  %v4534_v37 = vld [vmem:[#allocation4 + $0x28] sm:$0xf0]  ;;  %v3391_v38 = vld [vmem:[#allocation7 + $0x118] sm:$0xf]  ;;  %v4573_v39 = vld [vmem:[#allocation7 + $0x128] sm:$0xf0]  ;;  %v5132_v40 = vpack.c.bf16 %v131_v27, %v130_v26 }
  0x27   :  { %259 = vmatpush.bf16.msra.mxu2 %v211_v23  ;;  %273 = vmatpush.bf16.msra.mxu3 %v214_v24  ;;  %v4531_v41 = vld [vmem:[#allocation4 + $0x14] sm:$0xf]  ;;  %v3234_v42 = vld [vmem:[#allocation4 + $0x2c] sm:$0xf0]  ;;  %v4613_v46 = vld [vmem:[#allocation7 + $0x268] sm:$0xf0]  ;;  %v3392_v50 = vor.u32 %v4573_v39, %v3391_v38  ;;  %v3233_v53 = vor.u32 %v4534_v37, %v3232_v33 }
  0x28   :  { %v189_v34 = vpack.c.b16 %v175_v28, %v175_v28  ;;  %v190_v35 = vpack.c.b16 %v176_v29, %v176_v29  ;;  %v3551_v43 = vld [vmem:[#allocation7 + $0x258] sm:$0xf]  ;;  %v3240_v48 = vld [vmem:[#allocation4 + $0x18] sm:$0xf]  ;;  %v4653_v51 = vld [vmem:[#allocation7 + $0x3a8] sm:$0xf0]  ;;  %v3237_v54 = vor.u32 %v4531_v41, %v3234_v42 }
  0x29   :  { %v3711_v47 = vld [vmem:[#allocation7 + $0x398] sm:$0xf]  ;;  %v223_v52 = vsel %vm203_vm0, %v191_v36, 0  ;;  %v3371_v55 = vld [vmem:[#allocation7 + $0xf0] sm:$0xf]  ;;  %v3552_v57 = vor.u32 %v4613_v46, %v3551_v43  ;;  %vm3203_vm2 = vcmask 15360  }
  0x2a   :  { %232 = vmatpush.bf16.msra.mxu0 %v3217_v17  ;;  %246 = vmatpush.bf16.msra.mxu1 %v3221_v25  ;;  %v217_v44 = vsel %vm203_vm0, %v189_v34, 0  ;;  %v220_v45 = vsel %vm203_vm0, %v190_v35, 0  ;;  %v4535_v49 = vld [vmem:[#allocation4 + $0x30] sm:$0xf0]  ;;  %v4568_v56 = vld [vmem:[#allocation7 + $0x100] sm:$0xf0]  ;;  %v3712_v59 = vor.u32 %v4653_v51, %v3711_v47 }
  0x2b   :  { %260 = vmatpush.bf16.msra.mxu2 %v3225_v31  ;;  %274 = vmatpush.bf16.msra.mxu3 %v3229_v32  ;;  %v3531_v58 = vld [vmem:[#allocation7 + $0x230] sm:$0xf]  ;;  %v3871_v60 = vld [vmem:[#allocation7 + $0x4d8] sm:$0xf]  ;;  %v4693_v61 = vld [vmem:[#allocation7 + $0x4e8] sm:$0xf0]  ;;  %v3241_v1 = vor.u32 %v4535_v49, %v3240_v48  ;;  %v3372_v2 = vor.u32 %v4568_v56, %v3371_v55 }
  0x2c   :  { %v4608_v62 = vld [vmem:[#allocation7 + $0x240] sm:$0xf0]  ;;  %v3691_v63 = vld [vmem:[#allocation7 + $0x370] sm:$0xf]  ;;  %v3872_v3 = vor.u32 %v4693_v61, %v3871_v60  ;;  %v3351_v4 = vld [vmem:[#allocation7 + $0xc8] sm:$0xf] }
  0x2d   :  { %3242 = vmatmul.msk.bf16.vlgmr.msra.gmra.mxu0 %vm199_vm1, %v5132_v40  ;;  %3243 = vmatmul.msk.bf16.vlgmr.msra.gmra.mxu1 %vm199_vm1, %v5132_v40  ;;  %v4648_v0 = vld [vmem:[#allocation7 + $0x380] sm:$0xf0]  ;;  %v4563_v5 = vld [vmem:[#allocation7 + $0xd8] sm:$0xf0]  ;;  %v3532_v6 = vor.u32 %v4608_v62, %v3531_v58  ;;  %v3511_v7 = vld [vmem:[#allocation7 + $0x208] sm:$0xf] }
  0x2e   :  { %287 = vmatpush.bf16.msrb.mxu0 %v217_v44  ;;  %301 = vmatpush.bf16.msrb.mxu1 %v220_v45  ;;  %v3692_v8 = vor.u32 %v4648_v0, %v3691_v63  ;;  %v3851_v9 = vld [vmem:[#allocation7 + $0x4b0] sm:$0xf]  ;;  %v4688_v10 = vld [vmem:[#allocation7 + $0x4c0] sm:$0xf0]  ;;  %v4603_v11 = vld [vmem:[#allocation7 + $0x218] sm:$0xf0]  ;;  %v3352_v14 = vor.u32 %v4563_v5, %v3351_v4 }
  0x2f   :  { %3244 = vmatmul.msk.bf16.vlgmr.msra.gmra.mxu2 %vm199_vm1, %v5132_v40  ;;  %3245 = vmatmul.msk.bf16.vlgmr.msra.gmra.mxu3 %vm199_vm1, %v5132_v40  ;;  %v3671_v12 = vld [vmem:[#allocation7 + $0x348] sm:$0xf]  ;;  %v4643_v13 = vld [vmem:[#allocation7 + $0x358] sm:$0xf0]  ;;  %v3852_v15 = vor.u32 %v4688_v10, %v3851_v9  ;;  %v3331_v16 = vld [vmem:[#allocation7 + $0xa0] sm:$0xf]  ;;  %v3512_v18 = vor.u32 %v4603_v11, %v3511_v7 }
  0x30   :  { %315 = vmatpush.bf16.msrb.mxu2 %v223_v52  ;;  %2232 = vmatpush.bf16.msrb.mxu3 %v3392_v50  ;;  %v4558_v17 = vld [vmem:[#allocation7 + $0xb0] sm:$0xf0]  ;;  %v3672_v19 = vor.u32 %v4643_v13, %v3671_v12  ;;  %v3831_v20 = vld [vmem:[#allocation7 + $0x488] sm:$0xf]  ;;  %v4683_v21 = vld [vmem:[#allocation7 + $0x498] sm:$0xf0] }
  0x31   :  { %v3332_v22 = vor.u32 %v4558_v17, %v3331_v16  ;;  %v3491_v23 = vld [vmem:[#allocation7 + $0x1e0] sm:$0xf]  ;;  %v4598_v24 = vld [vmem:[#allocation7 + $0x1f0] sm:$0xf0]  ;;  %v3311_v25 = vld [vmem:[#allocation7 + $0x78] sm:$0xf]  ;;  %v3832_v26 = vor.u32 %v4683_v21, %v3831_v20 }
  0x32   :  { %288 = vmatpush.bf16.msrb.mxu0 %v3233_v53  ;;  %302 = vmatpush.bf16.msrb.mxu1 %v3237_v54  ;;  %v4553_v27 = vld [vmem:[#allocation7 + $0x88] sm:$0xf0]  ;;  %v3651_v28 = vld [vmem:[#allocation7 + $0x320] sm:$0xf]  ;;  %v4638_v29 = vld [vmem:[#allocation7 + $0x330] sm:$0xf0]  ;;  %v3492_v32 = vor.u32 %v4598_v24, %v3491_v23 }
  0x33   :  { %v3811_v30 = vld [vmem:[#allocation7 + $0x460] sm:$0xf]  ;;  %v4678_v31 = vld [vmem:[#allocation7 + $0x470] sm:$0xf0]  ;;  %v3312_v33 = vor.u32 %v4553_v27, %v3311_v25  ;;  %v3471_v34 = vld [vmem:[#allocation7 + $0x1b8] sm:$0xf]  ;;  %v3652_v36 = vor.u32 %v4638_v29, %v3651_v28 }
  0x34   :  { %316 = vmatpush.bf16.msrb.mxu2 %v3241_v1  ;;  %2233 = vmatpush.bf16.msrb.mxu3 %v3372_v2  ;;  %v4593_v35 = vld [vmem:[#allocation7 + $0x1c8] sm:$0xf0]  ;;  %v3291_v37 = vld [vmem:[#allocation7 + $0x50] sm:$0xf]  ;;  %v3812_v38 = vor.u32 %v4678_v31, %v3811_v30  ;;  %v4548_v39 = vld [vmem:[#allocation7 + $0x60] sm:$0xf0] }
  0x35   :  { %v3631_v41 = vld [vmem:[#allocation7 + $0x2f8] sm:$0xf]  ;;  %v4633_v42 = vld [vmem:[#allocation7 + $0x308] sm:$0xf0]  ;;  %v3472_v45 = vor.u32 %v4593_v35, %v3471_v34  ;;  %v3292_v46 = vor.u32 %v4548_v39, %v3291_v37  ;;  %v3451_v47 = vld [vmem:[#allocation7 + $0x190] sm:$0xf] }
  0x36   :  { %2246 = vmatpush.bf16.msra.mxu0 %v3552_v57  ;;  %2260 = vmatpush.bf16.msra.mxu1 %v3712_v59  ;;  %v3791_v43 = vld [vmem:[#allocation7 + $0x438] sm:$0xf]  ;;  %v4673_v44 = vld [vmem:[#allocation7 + $0x448] sm:$0xf0]  ;;  %v4588_v48 = vld [vmem:[#allocation7 + $0x1a0] sm:$0xf0]  ;;  %v3632_v49 = vor.u32 %v4633_v42, %v3631_v41 }
  0x37   :  { %v3271_v50 = vld [vmem:[#allocation7 + $0x28] sm:$0xf]  ;;  %v3792_v51 = vor.u32 %v4673_v44, %v3791_v43  ;;  %v4543_v52 = vld [vmem:[#allocation7 + $0x38] sm:$0xf0]  ;;  %v3611_v53 = vld [vmem:[#allocation7 + $0x2d0] sm:$0xf]  ;;  %v3452_v57 = vor.u32 %v4588_v48, %v3451_v47 }
  0x38   :  { %2274 = vmatpush.bf16.msra.mxu2 %v3872_v3  ;;  %2234 = vmatpush.bf16.msrb.mxu3 %v3352_v14  ;;  %v4628_v54 = vld [vmem:[#allocation7 + $0x2e0] sm:$0xf0]  ;;  %v3771_v55 = vld [vmem:[#allocation7 + $0x410] sm:$0xf]  ;;  %v3431_v58 = vld [vmem:[#allocation7 + $0x168] sm:$0xf] }
  0x39   :  { %v4668_v56 = vld [vmem:[#allocation7 + $0x420] sm:$0xf0]  ;;  %v4583_v59 = vld [vmem:[#allocation7 + $0x178] sm:$0xf0]  ;;  %v3612_v60 = vor.u32 %v4628_v54, %v3611_v53  ;;  %v3251_v61 = vld [vmem:[#allocation7] sm:$0xf] }
  0x3a   :  { %2247 = vmatpush.bf16.msra.mxu0 %v3532_v6  ;;  %2261 = vmatpush.bf16.msra.mxu1 %v3692_v8  ;;  %v4538_v62 = vld [vmem:[#allocation7 + $0x10] sm:$0xf0]  ;;  %v3772_v63 = vor.u32 %v4668_v56, %v3771_v55  ;;  %v4031_v0 = vld [vmem:[#allocation7 + $0x618] sm:$0xf]  ;;  %v3591_v1 = vld [vmem:[#allocation7 + $0x2a8] sm:$0xf]  ;;  %v3432_v6 = vor.u32 %v4583_v59, %v3431_v58 }
  0x3b   :  { %v4623_v2 = vld [vmem:[#allocation7 + $0x2b8] sm:$0xf0]  ;;  %v4733_v3 = vld [vmem:[#allocation7 + $0x628] sm:$0xf0]  ;;  %v3751_v4 = vld [vmem:[#allocation7 + $0x3e8] sm:$0xf]  ;;  %v3252_v9 = vor.u32 %v4538_v62, %v3251_v61 }
  0x3c   :  { %2275 = vmatpush.bf16.msra.mxu2 %v3852_v15  ;;  %2235 = vmatpush.bf16.msrb.mxu3 %v3332_v22  ;;  %v4663_v5 = vld [vmem:[#allocation7 + $0x3f8] sm:$0xf0]  ;;  %v3411_v7 = vld [vmem:[#allocation7 + $0x140] sm:$0xf]  ;;  %v4578_v8 = vld [vmem:[#allocation7 + $0x150] sm:$0xf0]  ;;  %v3592_v12 = vor.u32 %v4623_v2, %v3591_v1  ;;  %v4032_v14 = vor.u32 %v4733_v3, %v4031_v0 }
  0x3d   :  { %3246 = vmatmul.msk.bf16.vlgmr.msrb.gmra.mxu0 %vm199_vm1, %v5132_v40  ;;  %3247 = vmatmul.msk.bf16.vlgmr.msrb.gmra.mxu1 %vm199_vm1, %v5132_v40  ;;  %v4191_v10 = vld [vmem:[#allocation7 + $0x758] sm:$0xf]  ;;  %v4773_v11 = vld [vmem:[#allocation7 + $0x768] sm:$0xf0]  ;;  %v4011_v13 = vld [vmem:[#allocation7 + $0x5f0] sm:$0xf]  ;;  %v3752_v15 = vor.u32 %v4663_v5, %v3751_v4  ;;  %v3412_v22 = vor.u32 %v4578_v8, %v3411_v7 }
  0x3e   :  { %2248 = vmatpush.bf16.msra.mxu0 %v3512_v18  ;;  %2262 = vmatpush.bf16.msra.mxu1 %v3672_v19  ;;  %v4728_v16 = vld [vmem:[#allocation7 + $0x600] sm:$0xf0]  ;;  %v3571_v17 = vld [vmem:[#allocation7 + $0x280] sm:$0xf]  ;;  %v4618_v18 = vld [vmem:[#allocation7 + $0x290] sm:$0xf0] }
  0x3f   :  { %3248 = vmatmul.msk.bf16.vlgmr.msrb.gmra.mxu2 %vm199_vm1, %v5132_v40  ;;  %v3272_v40 = vor.u32 %v4543_v52, %v3271_v50  ;;  %v3731_v19 = vld [vmem:[#allocation7 + $0x3c0] sm:$0xf]  ;;  %v4658_v20 = vld [vmem:[#allocation7 + $0x3d0] sm:$0xf0]  ;;  %v4351_v21 = vld [vmem:[#allocation7 + $0x898] sm:$0xf]  ;;  %v3572_v27 = vor.u32 %v4618_v18, %v3571_v17  ;;  %v4012_v28 = vor.u32 %v4728_v16, %v4011_v13 }
  0x40   :  { %2276 = vmatpush.bf16.msra.mxu2 %v3832_v26  ;;  %2236 = vmatpush.bf16.msrb.mxu3 %v3312_v33  ;;  %v4813_v23 = vld [vmem:[#allocation7 + $0x8a8] sm:$0xf0]  ;;  %v4571_v24 = vld [vmem:[#allocation7 + $0x11c] sm:$0xf]  ;;  %v3393_v25 = vld [vmem:[#allocation7 + $0x12c] sm:$0xf0]  ;;  %v4192_v26 = vor.u32 %v4773_v11, %v4191_v10  ;;  %v3732_v31 = vor.u32 %v4658_v20, %v3731_v19 }
  0x41   :  { %v4171_v29 = vld [vmem:[#allocation7 + $0x730] sm:$0xf]  ;;  %v4768_v30 = vld [vmem:[#allocation7 + $0x740] sm:$0xf0]  ;;  %v3396_v33 = vor.u32 %v4571_v24, %v3393_v25  ;;  %v3991_v34 = vld [vmem:[#allocation7 + $0x5c8] sm:$0xf] }
  0x42   :  { %2249 = vmatpush.bf16.msra.mxu0 %v3492_v32  ;;  %2263 = vmatpush.bf16.msra.mxu1 %v3652_v36  ;;  %v4352_v32 = vor.u32 %v4813_v23, %v4351_v21  ;;  %v4723_v35 = vld [vmem:[#allocation7 + $0x5d8] sm:$0xf0]  ;;  %v4172_v36 = vor.u32 %v4768_v30, %v4171_v29  ;;  %v4331_v43 = vld [vmem:[#allocation7 + $0x870] sm:$0xf]  ;;  %v4808_v44 = vld [vmem:[#allocation7 + $0x880] sm:$0xf0] }
  0x43   :  { %v3992_v37 = vor.u32 %v4723_v35, %v3991_v34  ;;  %v4763_v39 = vld [vmem:[#allocation7 + $0x718] sm:$0xf0]  ;;  %v3373_v47 = vld [vmem:[#allocation7 + $0x104] sm:$0xf0]  ;;  %v4718_v50 = vld [vmem:[#allocation7 + $0x5b0] sm:$0xf0] }
  0x44   :  { %2277 = vmatpush.bf16.msra.mxu2 %v3812_v38  ;;  %2237 = vmatpush.bf16.msrb.mxu3 %v3292_v46  ;;  %v4151_v38 = vld [vmem:[#allocation7 + $0x708] sm:$0xf]  ;;  %v331_v42 = vld [vmem:[#allocation6] sm:$0x7f]  ;;  %v4332_v46 = vor.u32 %v4808_v44, %v4331_v43  ;;  %v4758_v53 = vld [vmem:[#allocation7 + $0x6f0] sm:$0xf0] }
  0x45   :  { %v4152_v41 = vor.u32 %v4763_v39, %v4151_v38  ;;  %333 = vst [vmem:[#allocation1] ss:$9 sm:$0xff] %v331_v42  ;;  %v4311_v55 = vld [vmem:[#allocation7 + $0x848] sm:$0xf]  ;;  %v4803_v56 = vld [vmem:[#allocation7 + $0x858] sm:$0xf0] }
  0x46   :  { %2250 = vmatpush.bf16.msra.mxu0 %v3472_v45  ;;  %2264 = vmatpush.bf16.msra.mxu1 %v3632_v49  ;;  %v4566_v45 = vld [vmem:[#allocation7 + $0xf4] sm:$0xf]  ;;  %v3971_v49 = vld [vmem:[#allocation7 + $0x5a0] sm:$0xf]  ;;  %v4561_v58 = vld [vmem:[#allocation7 + $0xcc] sm:$0xf] }
  0x47   :  { %v3376_v48 = vor.u32 %v4566_v45, %v3373_v47  ;;  %v3972_v52 = vor.u32 %v4718_v50, %v3971_v49  ;;  %v4713_v61 = vld [vmem:[#allocation7 + $0x588] sm:$0xf0]  ;;  %v4111_v62 = vld [vmem:[#allocation7 + $0x6b8] sm:$0xf]  ;;  %v4291_v2 = vld [vmem:[#allocation7 + $0x820] sm:$0xf] }
  0x48   :  { %2278 = vmatpush.bf16.msra.mxu2 %v3792_v51  ;;  %2238 = vmatpush.bf16.msrb.mxu3 %v3272_v40  ;;  %v4131_v51 = vld [vmem:[#allocation7 + $0x6e0] sm:$0xf]  ;;  %v4753_v0 = vld [vmem:[#allocation7 + $0x6c8] sm:$0xf0]  ;;  %v4798_v3 = vld [vmem:[#allocation7 + $0x830] sm:$0xf0] }
  0x49   :  { %v4132_v54 = vor.u32 %v4758_v53, %v4131_v51  ;;  %v3353_v40 = vld [vmem:[#allocation7 + $0xdc] sm:$0xf0]  ;;  %v4112_v1 = vor.u32 %v4753_v0, %v4111_v62  ;;  %v4556_v4 = vld [vmem:[#allocation7 + $0xa4] sm:$0xf]  ;;  %v4292_v5 = vor.u32 %v4798_v3, %v4291_v2  ;;  %v3931_v8 = vld [vmem:[#allocation7 + $0x550] sm:$0xf] }
  0x4a   :  { %2251 = vmatpush.bf16.msra.mxu0 %v3452_v57  ;;  %2265 = vmatpush.bf16.msra.mxu1 %v3612_v60  ;;  %v4312_v57 = vor.u32 %v4803_v56, %v4311_v55  ;;  %v3356_v59 = vor.u32 %v4561_v58, %v3353_v40  ;;  %v3951_v60 = vld [vmem:[#allocation7 + $0x578] sm:$0xf]  ;;  %v4091_v10 = vld [vmem:[#allocation7 + $0x690] sm:$0xf]  ;;  %v4748_v11 = vld [vmem:[#allocation7 + $0x6a0] sm:$0xf0] }
  0x4b   :  { %v4092_v13 = vor.u32 %v4748_v11, %v4091_v10  ;;  %v4551_v16 = vld [vmem:[#allocation7 + $0x7c] sm:$0xf]  ;;  %v3313_v18 = vld [vmem:[#allocation7 + $0x8c] sm:$0xf0]  ;;  %v3911_v20 = vld [vmem:[#allocation7 + $0x528] sm:$0xf] }
  0x4c   :  { %2279 = vmatpush.bf16.msra.mxu2 %v3772_v63  ;;  %2239 = vmatpush.bf16.msrb.mxu3 %v3252_v9  ;;  %v3952_v63 = vor.u32 %v4713_v61, %v3951_v60  ;;  %v4708_v9 = vld [vmem:[#allocation7 + $0x560] sm:$0xf0]  ;;  %v3316_v19 = vor.u32 %v4551_v16, %v3313_v18  ;;  %v4703_v21 = vld [vmem:[#allocation7 + $0x538] sm:$0xf0]  ;;  %v3293_v30 = vld [vmem:[#allocation7 + $0x64] sm:$0xf0] }
  0x4d   :  { %v3912_v23 = vor.u32 %v4703_v21, %v3911_v20  ;;  %v4743_v24 = vld [vmem:[#allocation7 + $0x678] sm:$0xf0]  ;;  %v4051_v34 = vld [vmem:[#allocation7 + $0x640] sm:$0xf]  ;;  %v4231_v38 = vld [vmem:[#allocation7 + $0x7a8] sm:$0xf] }
  0x4e   :  { %2252 = vmatpush.bf16.msra.mxu0 %v3432_v6  ;;  %2266 = vmatpush.bf16.msra.mxu1 %v3592_v12  ;;  %v3333_v6 = vld [vmem:[#allocation7 + $0xb4] sm:$0xf0]  ;;  %v3932_v12 = vor.u32 %v4708_v9, %v3931_v8  ;;  %v4783_v39 = vld [vmem:[#allocation7 + $0x7b8] sm:$0xf0]  ;;  %v3273_v42 = vld [vmem:[#allocation7 + $0x3c] sm:$0xf0] }
  0x4f   :  { %v3336_v7 = vor.u32 %v4556_v4, %v3333_v6  ;;  %v4232_v43 = vor.u32 %v4783_v39, %v4231_v38  ;;  %v4211_v45 = vld [vmem:[#allocation7 + $0x780] sm:$0xf]  ;;  %v3253_v49 = vld [vmem:[#allocation7 + $0x14] sm:$0xf0]  ;;  %v334_v51 = vld [vmem:[#allocation1] sm:$0xff] }
  0x50   :  { %2288 = vmatpush.bf16.msra.mxu3 %v4032_v14  ;;  %2280 = vmatpush.bf16.msra.mxu2 %v3752_v15  ;;  %v4271_v14 = vld [vmem:[#allocation7 + $0x7f8] sm:$0xf]  ;;  %v4793_v15 = vld [vmem:[#allocation7 + $0x808] sm:$0xf0]  ;;  %v336_v53 = vld [vmem:[#allocation1 + $0x12] sm:$0xff]  ;;  %v341_v40 = vpack.i.b16 %v334_v51, %v334_v51 }
  0x51   :  { %v4272_v17 = vor.u32 %v4793_v15, %v4271_v14  ;;  %v338_v55 = vld [vmem:[#allocation1 + $0x24] sm:$0xff]  ;;  %v339_v56 = vld [vmem:[#allocation1 + $0x2d] sm:$0xff]  ;;  %v3533_v38 = vld [vmem:[#allocation7 + $0x244] sm:$0xf0] }
  0x52   :  { %2253 = vmatpush.bf16.msra.mxu0 %v3412_v22  ;;  %2267 = vmatpush.bf16.msra.mxu1 %v3572_v27  ;;  %v4071_v22 = vld [vmem:[#allocation7 + $0x668] sm:$0xf]  ;;  %v4788_v27 = vld [vmem:[#allocation7 + $0x7e0] sm:$0xf0]  ;;  %v4611_v20 = vld [vmem:[#allocation7 + $0x25c] sm:$0xf] }
  0x53   :  { %v4072_v25 = vor.u32 %v4743_v24, %v4071_v22  ;;  %v2728_v58 = vld [vmem:[#allocation9] sm:$0x1f]  ;;  %v3553_v24 = vld [vmem:[#allocation7 + $0x26c] sm:$0xf0] }
  0x54   :  { %2289 = vmatpush.bf16.msra.mxu3 %v4012_v28  ;;  %2281 = vmatpush.bf16.msra.mxu2 %v3732_v31  ;;  %v4546_v28 = vld [vmem:[#allocation7 + $0x54] sm:$0xf] }
  0x55   :  { %v3296_v31 = vor.u32 %v4546_v28, %v3293_v30 }
  0x56   :  { %2302 = vmatpush.bf16.msrb.mxu0 %v4192_v26  ;;  %2316 = vmatpush.bf16.msrb.mxu1 %v4352_v32  ;;  %v4251_v26 = vld [vmem:[#allocation7 + $0x7d0] sm:$0xf]  ;;  %v3891_v32 = vld [vmem:[#allocation7 + $0x500] sm:$0xf] }
  0x57   :  { %v4252_v29 = vor.u32 %v4788_v27, %v4251_v26  ;;  %v3713_v26 = vld [vmem:[#allocation7 + $0x3ac] sm:$0xf0] }
  0x58   :  { %2330 = vmatpush.bf16.msrb.mxu2 %v3396_v33  ;;  %2290 = vmatpush.bf16.msra.mxu3 %v3992_v37  ;;  %v4698_v33 = vld [vmem:[#allocation7 + $0x510] sm:$0xf0] }
  0x59   :  { %v3892_v35 = vor.u32 %v4698_v33, %v3891_v32 }
  0x5a   :  { %2303 = vmatpush.bf16.msrb.mxu0 %v4172_v36  ;;  %2317 = vmatpush.bf16.msrb.mxu1 %v4332_v46  ;;  %v4738_v36 = vld [vmem:[#allocation7 + $0x650] sm:$0xf0] }
  0x5b   :  { %v4052_v37 = vor.u32 %v4738_v36, %v4051_v34  ;;  %v4778_v46 = vld [vmem:[#allocation7 + $0x790] sm:$0xf0] }
  0x5c   :  { %2331 = vmatpush.bf16.msrb.mxu2 %v3376_v48  ;;  %2291 = vmatpush.bf16.msra.mxu3 %v3972_v52  ;;  %v4212_v47 = vor.u32 %v4778_v46, %v4211_v45  ;;  %v4536_v48 = vld [vmem:[#allocation7 + $0x4] sm:$0xf]  ;;  %v335_v52 = vld [vmem:[#allocation1 + $0x9] sm:$0xff] }
  0x5d   :  { %v3256_v50 = vor.u32 %v4536_v48, %v3253_v49  ;;  %v4646_v46 = vld [vmem:[#allocation7 + $0x374] sm:$0xf] }
  0x5e   :  { %2304 = vmatpush.bf16.msrb.mxu0 %v4152_v41  ;;  %2318 = vmatpush.bf16.msrb.mxu1 %v4312_v57  ;;  %v4541_v41 = vld [vmem:[#allocation7 + $0x2c] sm:$0xf]  ;;  %v5151_v57 = vld [vmem:[#allocation1 + $0x36] sm:$0xff] }
  0x5f   :  { %v3276_v44 = vor.u32 %v4541_v41, %v3273_v42 }
  0x60   :  { %2332 = vmatpush.bf16.msrb.mxu2 %v3356_v59  ;;  %2292 = vmatpush.bf16.msra.mxu3 %v3952_v63  ;;  %v344_v59 = vpack.i.b16 %v335_v52, %v335_v52  ;;  %v343_v63 = vperm.slane %v341_v40, 0  ;;  %v4691_v52 = vld [vmem:[#allocation7 + $0x4dc] sm:$0xf]  ;;  %v359_v40 = vpack.i.b16 %v5151_v57, %v5151_v57 }
  0x62   :  { %2305 = vmatpush.bf16.msrb.mxu0 %v4132_v54  ;;  %2319 = vmatpush.bf16.msrb.mxu1 %v4292_v5  ;;  %v337_v54 = vld [vmem:[#allocation1 + $0x1b] sm:$0xff]  ;;  %v346_v0 = vperm.slane %v344_v59, 0  ;;  %v376_v5 = vunpack.c.l.bf16 %v343_v63 }
  0x63   :  { %2730 = vst [vmem:[#allocation1] ss:$9 sm:$0xff] %v2728_v58  ;;  %v350_v2 = vpack.i.b16 %v337_v54, %v337_v54  ;;  %v4601_v63 = vld [vmem:[#allocation7 + $0x20c] sm:$0xf] }
  0x64   :  { %2333 = vmatpush.bf16.msrb.mxu2 %v3336_v7  ;;  %2293 = vmatpush.bf16.msra.mxu3 %v3932_v12  ;;  %v377_v6 = vunpack.c.l.bf16 %v346_v0 }
  0x65   :  { %v352_v14 = vperm.slane %v350_v2, 0 }
  0x66   :  { %2306 = vmatpush.bf16.msrb.mxu0 %v4112_v1  ;;  %2320 = vmatpush.bf16.msrb.mxu1 %v4272_v17  ;;  %v347_v1 = vpack.i.b16 %v336_v53, %v336_v53  ;;  %v3873_v53 = vld [vmem:[#allocation7 + $0x4ec] sm:$0xf0] }
  0x67   :  { %v379_v30 = vunpack.c.l.bf16 %v352_v14  ;;  %v3876_v2 = vor.u32 %v4691_v52, %v3873_v53  ;;  %v5167_v14 = vperm.slane %v359_v40, 0  ;;  %v4591_v53 = vld [vmem:[#allocation7 + $0x1bc] sm:$0xf] }
  0x68   :  { %2334 = vmatpush.bf16.msrb.mxu2 %v3316_v19  ;;  %2294 = vmatpush.bf16.msra.mxu3 %v3912_v23  ;;  %v353_v19 = vpack.i.b16 %v338_v55, %v338_v55  ;;  %v356_v23 = vpack.i.b16 %v339_v56, %v339_v56 }
  0x6a   :  { %2307 = vmatpush.bf16.msrb.mxu0 %v4092_v13  ;;  %2321 = vmatpush.bf16.msrb.mxu1 %v4252_v29  ;;  %v349_v13 = vperm.slane %v347_v1, 0  ;;  %v5159_v51 = vperm.slane %v356_v23, 0 }
  0x6c   :  { %2335 = vmatpush.bf16.msrb.mxu2 %v3296_v31  ;;  %2295 = vmatpush.bf16.msra.mxu3 %v3892_v35  ;;  %v378_v29 = vunpack.c.l.bf16 %v349_v13  ;;  %v4606_v31 = vld [vmem:[#allocation7 + $0x234] sm:$0xf] }
  0x6d   :  { %v3536_v59 = vor.u32 %v4606_v31, %v3533_v38  ;;  %v3493_v31 = vld [vmem:[#allocation7 + $0x1f4] sm:$0xf0]  ;;  %v4681_v38 = vld [vmem:[#allocation7 + $0x48c] sm:$0xf] }
  0x6e   :  { %2308 = vmatpush.bf16.msrb.mxu0 %v4072_v25  ;;  %2322 = vmatpush.bf16.msrb.mxu1 %v4232_v43  ;;  %v4651_v25 = vld [vmem:[#allocation7 + $0x39c] sm:$0xf]  ;;  %v5153_v43 = vperm.slane %v353_v19, 0  ;;  %v3853_v19 = vld [vmem:[#allocation7 + $0x4c4] sm:$0xf0] }
  0x6f   :  { %v3716_v45 = vor.u32 %v4651_v25, %v3713_v26  ;;  %v4726_v25 = vld [vmem:[#allocation7 + $0x5f4] sm:$0xf]  ;;  %v4013_v26 = vld [vmem:[#allocation7 + $0x604] sm:$0xf0] }
  0x70   :  { %2336 = vmatpush.bf16.msrb.mxu2 %v3276_v44  ;;  %v3556_v44 = vor.u32 %v4611_v20, %v3553_v24 }
  0x72   :  { %2309 = vmatpush.bf16.msrb.mxu0 %v4052_v37  ;;  %2323 = vmatpush.bf16.msrb.mxu1 %v4212_v47  ;;  %v3693_v47 = vld [vmem:[#allocation7 + $0x384] sm:$0xf0] }
  0x74   :  { %2337 = vmatpush.bf16.msrb.mxu2 %v3256_v50 }
  0xaa   :  { %v234_v60 = vpop.f32.mrf.mxu0  ;;  %v248_v61 = vpop.f32.mrf.mxu1 }
  0xab   :  { %v323_v62 = vpack.c.bf16 %v248_v61, %v234_v60  ;;  %v3696_v60 = vor.u32 %v4646_v46, %v3693_v47  ;;  %v4731_v61 = vld [vmem:[#allocation7 + $0x61c] sm:$0xf]  ;;  %v3993_v46 = vld [vmem:[#allocation7 + $0x5dc] sm:$0xf0] }
  0xad   :  { %v362_v3 = vunpack.c.l.bf16 %v323_v62  ;;  %v363_v4 = vunpack.c.h.bf16 %v323_v62  ;;  %v4033_v62 = vld [vmem:[#allocation7 + $0x62c] sm:$0xf0] }
  0xaf   :  { %v383_v15 = vadd.f32 %v376_v5, %v362_v3  ;;  %v384_v16 = vadd.f32 %v377_v6, %v363_v4  ;;  %v3513_v3 = vld [vmem:[#allocation7 + $0x21c] sm:$0xf0]  ;;  %v4641_v4 = vld [vmem:[#allocation7 + $0x34c] sm:$0xf] }
  0xb1   :  { %v419_v32 = vmax.f32 %v383_v15, 0.0  ;;  %v420_v33 = vmax.f32 %v384_v16, 0.0  ;;  %v4036_v15 = vor.u32 %v4731_v61, %v4033_v62  ;;  %v3516_v16 = vor.u32 %v4601_v63, %v3513_v3  ;;  %v4676_v62 = vld [vmem:[#allocation7 + $0x464] sm:$0xf]  ;;  %v3973_v3 = vld [vmem:[#allocation7 + $0x5b4] sm:$0xf0] }
  0xb2   :  { %v262_v7 = vpop.f32.mrf.mxu2  ;;  %v276_v8 = vpop.f32.mrf.mxu3 }
  0xb3   :  { %v236_v9 = vpop.f32.mrf.mxu0  ;;  %v250_v10 = vpop.f32.mrf.mxu1  ;;  %v324_v12 = vpack.c.bf16 %v276_v8, %v262_v7  ;;  %v380_v8 = vunpack.c.l.bf16 %v5153_v43 }
  0xb4   :  { %v327_v11 = vpack.c.bf16 %v250_v10, %v236_v9  ;;  %v381_v9 = vunpack.c.l.bf16 %v5159_v51 }
  0xb5   :  { %v364_v27 = vunpack.c.l.bf16 %v324_v12  ;;  %v365_v28 = vunpack.c.h.bf16 %v324_v12 }
  0xb6   :  { %v369_v17 = vunpack.c.l.bf16 %v327_v11  ;;  %v370_v18 = vunpack.c.h.bf16 %v327_v11 }
  0xb7   :  { %v385_v54 = vadd.f32 %v378_v29, %v364_v27  ;;  %v386_v55 = vadd.f32 %v379_v30, %v365_v28  ;;  %v4596_v27 = vld [vmem:[#allocation7 + $0x1e4] sm:$0xf] }
  0xb8   :  { %v390_v21 = vadd.f32 %v376_v5, %v369_v17  ;;  %v391_v22 = vadd.f32 %v377_v6, %v370_v18  ;;  %v3673_v5 = vld [vmem:[#allocation7 + $0x35c] sm:$0xf0]  ;;  %v4686_v18 = vld [vmem:[#allocation7 + $0x4b4] sm:$0xf] }
  0xb9   :  { %v421_v57 = vmax.f32 %v385_v54, 0.0  ;;  %v422_v10 = vmax.f32 %v386_v55, 0.0  ;;  %v3676_v17 = vor.u32 %v4641_v4, %v3673_v5  ;;  %v3473_v54 = vld [vmem:[#allocation7 + $0x1cc] sm:$0xf0]  ;;  %v4631_v55 = vld [vmem:[#allocation7 + $0x2fc] sm:$0xf] }
  0xba   :  { %v426_v34 = vmax.f32 %v390_v21, 0.0  ;;  %v427_v35 = vmax.f32 %v391_v22, 0.0  ;;  %v264_v36 = vpop.f32.mrf.mxu2  ;;  %v278_v37 = vpop.f32.mrf.mxu3 }
  0xbb   :  { %v328_v39 = vpack.c.bf16 %v278_v37, %v264_v36  ;;  %v290_v41 = vpop.f32.mrf.mxu0  ;;  %v304_v42 = vpop.f32.mrf.mxu1  ;;  %v3856_v36 = vor.u32 %v4686_v18, %v3853_v19  ;;  %v4016_v37 = vor.u32 %v4726_v25, %v4013_v26  ;;  %v4711_v18 = vld [vmem:[#allocation7 + $0x57c] sm:$0xf]  ;;  %v3953_v19 = vld [vmem:[#allocation7 + $0x58c] sm:$0xf0]  ;;  %v3433_v25 = vld [vmem:[#allocation7 + $0x17c] sm:$0xf0] }
  0xbc   :  { %v5155_v48 = vpack.c.bf16 %v426_v34, %v419_v32  ;;  %v5157_v49 = vpack.c.bf16 %v427_v35, %v420_v33  ;;  %v325_v50 = vpack.c.bf16 %v304_v42, %v290_v41  ;;  %v4636_v32 = vld [vmem:[#allocation7 + $0x324] sm:$0xf]  ;;  %v3653_v33 = vld [vmem:[#allocation7 + $0x334] sm:$0xf0]  ;;  %v382_v41 = vunpack.c.l.bf16 %v5167_v14  ;;  %v4671_v14 = vld [vmem:[#allocation7 + $0x43c] sm:$0xf] }
  0xbd   :  { %v371_v56 = vunpack.c.l.bf16 %v328_v39  ;;  %v372_v58 = vunpack.c.h.bf16 %v328_v39  ;;  %v3496_v42 = vor.u32 %v4596_v27, %v3493_v31  ;;  %v3656_v43 = vor.u32 %v4636_v32, %v3653_v33  ;;  %v4621_v27 = vld [vmem:[#allocation7 + $0x2ac] sm:$0xf]  ;;  %v4666_v31 = vld [vmem:[#allocation7 + $0x414] sm:$0xf]  ;;  %v3773_v33 = vld [vmem:[#allocation7 + $0x424] sm:$0xf0] }
  0xbe   :  { %2240 = vmatmul.bf16.vlgmr.msrb.gmra.mxu3 %v5155_v48  ;;  %2254 = vmatmul.bf16.vlgmr.msra.gmra.mxu0 %v5157_v49  ;;  %v366_v6 = vunpack.c.l.bf16 %v325_v50  ;;  %v367_v7 = vunpack.c.h.bf16 %v325_v50 }
  0xbf   :  { %v392_v0 = vadd.f32 %v378_v29, %v371_v56  ;;  %v393_v1 = vadd.f32 %v379_v30, %v372_v58  ;;  %2344 = vmatpush.bf16.msrb.mxu3 %v3556_v44  ;;  %2358 = vmatpush.bf16.msra.mxu0 %v3716_v45  ;;  %v3833_v44 = vld [vmem:[#allocation7 + $0x49c] sm:$0xf0]  ;;  %v4721_v45 = vld [vmem:[#allocation7 + $0x5cc] sm:$0xf]  ;;  %v3633_v56 = vld [vmem:[#allocation7 + $0x30c] sm:$0xf0] }
  0xc0   :  { %v387_v28 = vadd.f32 %v380_v8, %v366_v6  ;;  %v388_v29 = vadd.f32 %v381_v9, %v367_v7  ;;  %v3996_v61 = vor.u32 %v4721_v45, %v3993_v46  ;;  %v3476_v6 = vor.u32 %v4591_v53, %v3473_v54  ;;  %v4701_v53 = vld [vmem:[#allocation7 + $0x52c] sm:$0xf]  ;;  %v3913_v54 = vld [vmem:[#allocation7 + $0x53c] sm:$0xf0] }
  0xc1   :  { %v428_v11 = vmax.f32 %v392_v0, 0.0  ;;  %v429_v12 = vmax.f32 %v393_v1, 0.0  ;;  %v3813_v1 = vld [vmem:[#allocation7 + $0x474] sm:$0xf0]  ;;  %v3636_v7 = vor.u32 %v4631_v55, %v3633_v56  ;;  %v3776_v45 = vor.u32 %v4666_v31, %v3773_v33 }
  0xc2   :  { %v318_v13 = vpop.f32.mrf.mxu2  ;;  %v423_v47 = vmax.f32 %v387_v28, 0.0  ;;  %v424_v50 = vmax.f32 %v388_v29, 0.0  ;;  %v3593_v28 = vld [vmem:[#allocation7 + $0x2bc] sm:$0xf0]  ;;  %v4293_v31 = vld [vmem:[#allocation7 + $0x834] sm:$0xf0] }
  0xc3   :  { %v5169_v20 = vpack.c.bf16 %v428_v11, %v421_v57  ;;  %v5171_v21 = vpack.c.bf16 %v429_v12, %v422_v10  ;;  %v326_v22 = vpack.c.bf16 %v318_v13, %v318_v13  ;;  %2345 = vmatpush.bf16.msrb.mxu3 %v3536_v59  ;;  %2359 = vmatpush.bf16.msra.mxu0 %v3696_v60  ;;  %v292_v23 = vpop.f32.mrf.mxu0  ;;  %v306_v24 = vpop.f32.mrf.mxu1  ;;  %v3453_v57 = vld [vmem:[#allocation7 + $0x1a4] sm:$0xf0]  ;;  %v4626_v10 = vld [vmem:[#allocation7 + $0x2d4] sm:$0xf] }
  0xc4   :  { %v329_v30 = vpack.c.bf16 %v306_v24, %v292_v23  ;;  %v3836_v60 = vor.u32 %v4681_v38, %v3833_v44  ;;  %v3613_v11 = vld [vmem:[#allocation7 + $0x2e4] sm:$0xf0]  ;;  %v3816_v12 = vor.u32 %v4676_v62, %v3813_v1  ;;  %v4581_v24 = vld [vmem:[#allocation7 + $0x16c] sm:$0xf]  ;;  %v4576_v38 = vld [vmem:[#allocation7 + $0x144] sm:$0xf] }
  0xc5   :  { %2268 = vmatmul.bf16.vlgmr.msra.gmra.mxu1 %v5169_v20  ;;  %2282 = vmatmul.bf16.vlgmr.msra.gmra.mxu2 %v5171_v21  ;;  %v368_v39 = vunpack.c.l.bf16 %v326_v22  ;;  %v3616_v23 = vor.u32 %v4626_v10, %v3613_v11  ;;  %v4193_v44 = vld [vmem:[#allocation7 + $0x76c] sm:$0xf0]  ;;  %v4656_v1 = vld [vmem:[#allocation7 + $0x3c4] sm:$0xf] }
  0xc6   :  { %v373_v34 = vunpack.c.l.bf16 %v329_v30  ;;  %v374_v35 = vunpack.c.h.bf16 %v329_v30  ;;  %2372 = vmatpush.bf16.msra.mxu1 %v3876_v2  ;;  %2386 = vmatpush.bf16.msra.mxu2 %v4036_v15  ;;  %v4716_v2 = vld [vmem:[#allocation7 + $0x5a4] sm:$0xf]  ;;  %v3793_v15 = vld [vmem:[#allocation7 + $0x44c] sm:$0xf0]  ;;  %v3956_v30 = vor.u32 %v4711_v18, %v3953_v19 }
  0xc7   :  { %2346 = vmatpush.bf16.msrb.mxu3 %v3516_v16  ;;  %2360 = vmatpush.bf16.msra.mxu0 %v3676_v17  ;;  %v389_v63 = vadd.f32 %v382_v41, %v368_v39  ;;  %v3976_v13 = vor.u32 %v4716_v2, %v3973_v3  ;;  %v3796_v29 = vor.u32 %v4671_v14, %v3793_v15  ;;  %v3413_v39 = vld [vmem:[#allocation7 + $0x154] sm:$0xf0]  ;;  %v4696_v3 = vld [vmem:[#allocation7 + $0x504] sm:$0xf]  ;;  %v4153_v15 = vld [vmem:[#allocation7 + $0x71c] sm:$0xf0] }
  0xc8   :  { %v394_v51 = vadd.f32 %v380_v8, %v373_v34  ;;  %v395_v52 = vadd.f32 %v381_v9, %v374_v35  ;;  %v4586_v8 = vld [vmem:[#allocation7 + $0x194] sm:$0xf]  ;;  %v3933_v35 = vld [vmem:[#allocation7 + $0x564] sm:$0xf0]  ;;  %v3416_v55 = vor.u32 %v4576_v38, %v3413_v39  ;;  %v3733_v2 = vld [vmem:[#allocation7 + $0x3d4] sm:$0xf0] }
  0xc9   :  { %v425_v16 = vmax.f32 %v389_v63, 0.0  ;;  %v3456_v22 = vor.u32 %v4586_v8, %v3453_v57  ;;  %v4706_v34 = vld [vmem:[#allocation7 + $0x554] sm:$0xf]  ;;  %v3916_v63 = vor.u32 %v4701_v53, %v3913_v54  ;;  %v4604_v38 = vld [vmem:[#allocation7 + $0x220] sm:$0xf0] }
  0xca   :  { %v430_v58 = vmax.f32 %v394_v51, 0.0  ;;  %v431_v40 = vmax.f32 %v395_v52, 0.0  ;;  %2373 = vmatpush.bf16.msra.mxu1 %v3856_v36  ;;  %2387 = vmatpush.bf16.msra.mxu2 %v4016_v37  ;;  %v320_v59 = vpop.f32.mrf.mxu2  ;;  %v3436_v36 = vor.u32 %v4581_v24, %v3433_v25  ;;  %v3596_v37 = vor.u32 %v4621_v27, %v3593_v28  ;;  %v4661_v51 = vld [vmem:[#allocation7 + $0x3ec] sm:$0xf]  ;;  %v3753_v52 = vld [vmem:[#allocation7 + $0x3fc] sm:$0xf0] }
  0xcb   :  { %v330_v0 = vpack.c.bf16 %v320_v59, %v320_v59  ;;  %2347 = vmatpush.bf16.msrb.mxu3 %v3496_v42  ;;  %2361 = vmatpush.bf16.msra.mxu0 %v3656_v43  ;;  %v3573_v42 = vld [vmem:[#allocation7 + $0x294] sm:$0xf0]  ;;  %v4771_v43 = vld [vmem:[#allocation7 + $0x75c] sm:$0xf]  ;;  %v3936_v46 = vor.u32 %v4706_v34, %v3933_v35  ;;  %v4766_v59 = vld [vmem:[#allocation7 + $0x734] sm:$0xf]  ;;  %v3756_v62 = vor.u32 %v4661_v51, %v3753_v52 }
  0xcc   :  { %v5176_v4 = vpack.c.bf16 %v430_v58, %v423_v47  ;;  %v5178_v5 = vpack.c.bf16 %v431_v40, %v424_v50  ;;  %v4811_v47 = vld [vmem:[#allocation7 + $0x89c] sm:$0xf]  ;;  %v4353_v50 = vld [vmem:[#allocation7 + $0x8ac] sm:$0xf0]  ;;  %v4196_v58 = vor.u32 %v4771_v43, %v4193_v44  ;;  %v4574_v8 = vld [vmem:[#allocation7 + $0x130] sm:$0xf0] }
  0xcd   :  { %v375_v9 = vunpack.c.l.bf16 %v330_v0  ;;  %v4356_v40 = vor.u32 %v4811_v47, %v4353_v50  ;;  %v4333_v0 = vld [vmem:[#allocation7 + $0x884] sm:$0xf0]  ;;  %v4614_v57 = vld [vmem:[#allocation7 + $0x270] sm:$0xf0]  ;;  %v3539_v24 = vld [vmem:[#allocation7 + $0x238] sm:$0xf] }
  0xce   :  { %2374 = vmatpush.bf16.msra.mxu1 %v3836_v60  ;;  %2388 = vmatpush.bf16.msra.mxu2 %v3996_v61  ;;  %v4173_v60 = vld [vmem:[#allocation7 + $0x744] sm:$0xf0]  ;;  %v4806_v61 = vld [vmem:[#allocation7 + $0x874] sm:$0xf]  ;;  %v4609_v25 = vld [vmem:[#allocation7 + $0x248] sm:$0xf0] }
  0xcf   :  { %v396_v17 = vadd.f32 %v382_v41, %v375_v9  ;;  %2296 = vmatmul.bf16.vlgmr.msra.gmra.mxu3 %v5176_v4  ;;  %2310 = vmatmul.bf16.vlgmr.msrb.gmra.mxu0 %v5178_v5  ;;  %v4616_v41 = vld [vmem:[#allocation7 + $0x284] sm:$0xf]  ;;  %v3559_v9 = vld [vmem:[#allocation7 + $0x260] sm:$0xf]  ;;  %v4176_v10 = vor.u32 %v4766_v59, %v4173_v60  ;;  %v4336_v11 = vor.u32 %v4806_v61, %v4333_v0  ;;  %v3359_v35 = vld [vmem:[#allocation7 + $0xd0] sm:$0xf] }
  0xd0   :  { %2348 = vmatpush.bf16.msrb.mxu3 %v3476_v6  ;;  %2362 = vmatpush.bf16.msra.mxu0 %v3636_v7  ;;  %v3576_v56 = vor.u32 %v4616_v41, %v3573_v42  ;;  %v3893_v6 = vld [vmem:[#allocation7 + $0x514] sm:$0xf0]  ;;  %v3399_v7 = vld [vmem:[#allocation7 + $0x120] sm:$0xf]  ;;  %v3560_v19 = vor.u32 %v4614_v57, %v3559_v9  ;;  %v4756_v28 = vld [vmem:[#allocation7 + $0x6e4] sm:$0xf]  ;;  %v3540_v34 = vor.u32 %v4609_v25, %v3539_v24 }
  0xd1   :  { %v432_v26 = vmax.f32 %v396_v17, 0.0  ;;  %v3896_v14 = vor.u32 %v4696_v3, %v3893_v6  ;;  %v4313_v17 = vld [vmem:[#allocation7 + $0x85c] sm:$0xf0]  ;;  %v3400_v18 = vor.u32 %v4574_v8, %v3399_v7  ;;  %v4751_v42 = vld [vmem:[#allocation7 + $0x6bc] sm:$0xf] }
  0xd2   :  { %2375 = vmatpush.bf16.msra.mxu1 %v3816_v12  ;;  %2389 = vmatpush.bf16.msra.mxu2 %v3976_v13  ;;  %v4761_v12 = vld [vmem:[#allocation7 + $0x70c] sm:$0xf]  ;;  %v3736_v13 = vor.u32 %v4656_v1, %v3733_v2  ;;  %v4113_v43 = vld [vmem:[#allocation7 + $0x6cc] sm:$0xf0]  ;;  %v4791_v44 = vld [vmem:[#allocation7 + $0x7fc] sm:$0xf] }
  0xd3   :  { %v5182_v32 = vpack.c.bf16 %v432_v26, %v425_v16  ;;  %v4801_v16 = vld [vmem:[#allocation7 + $0x84c] sm:$0xf]  ;;  %v4156_v26 = vor.u32 %v4761_v12, %v4153_v15  ;;  %v3339_v50 = vld [vmem:[#allocation7 + $0xa8] sm:$0xf]  ;;  %v4559_v51 = vld [vmem:[#allocation7 + $0xb8] sm:$0xf0]  ;;  %v4116_v54 = vor.u32 %v4751_v42, %v4113_v43 }
  0xd4   :  { %2349 = vmatpush.bf16.msrb.mxu3 %v3456_v22  ;;  %2363 = vmatpush.bf16.msra.mxu0 %v3616_v23  ;;  %v3379_v22 = vld [vmem:[#allocation7 + $0xf8] sm:$0xf]  ;;  %v4569_v23 = vld [vmem:[#allocation7 + $0x108] sm:$0xf0]  ;;  %v4316_v27 = vor.u32 %v4801_v16, %v4313_v17  ;;  %v3499_v52 = vld [vmem:[#allocation7 + $0x1e8] sm:$0xf]  ;;  %v3340_v60 = vor.u32 %v4559_v51, %v3339_v50 }
  0xd5   :  { %2324 = vmatmul.bf16.vlgmr.msrb.gmra.mxu1 %v5182_v32  ;;  %2338 = vmatmul.bf16.vlgmr.msrb.gmra.mxu2 %v5155_v48  ;;  %v3380_v33 = vor.u32 %v4569_v23, %v3379_v22  ;;  %v4599_v53 = vld [vmem:[#allocation7 + $0x1f8] sm:$0xf0]  ;;  %v4253_v59 = vld [vmem:[#allocation7 + $0x7e4] sm:$0xf0]  ;;  %v3479_v0 = vld [vmem:[#allocation7 + $0x1c0] sm:$0xf] }
  0xd6   :  { %2376 = vmatpush.bf16.msra.mxu1 %v3796_v29  ;;  %2390 = vmatpush.bf16.msra.mxu2 %v3956_v30  ;;  %v4133_v29 = vld [vmem:[#allocation7 + $0x6f4] sm:$0xf0]  ;;  %v4796_v30 = vld [vmem:[#allocation7 + $0x824] sm:$0xf]  ;;  %v3500_v61 = vor.u32 %v4599_v53, %v3499_v52  ;;  %v4594_v1 = vld [vmem:[#allocation7 + $0x1d0] sm:$0xf0] }
  0xd7   :  { %v4136_v39 = vor.u32 %v4756_v28, %v4133_v29  ;;  %v4296_v41 = vor.u32 %v4796_v30, %v4293_v31  ;;  %v4741_v6 = vld [vmem:[#allocation7 + $0x66c] sm:$0xf]  ;;  %v4073_v7 = vld [vmem:[#allocation7 + $0x67c] sm:$0xf0]  ;;  %v4736_v17 = vld [vmem:[#allocation7 + $0x644] sm:$0xf] }
  0xd8   :  { %2350 = vmatpush.bf16.msrb.mxu3 %v3436_v36  ;;  %2364 = vmatpush.bf16.msra.mxu0 %v3596_v37  ;;  %v4564_v36 = vld [vmem:[#allocation7 + $0xe0] sm:$0xf0]  ;;  %v3519_v37 = vld [vmem:[#allocation7 + $0x210] sm:$0xf]  ;;  %v4781_v8 = vld [vmem:[#allocation7 + $0x7ac] sm:$0xf]  ;;  %v4076_v15 = vor.u32 %v4741_v6, %v4073_v7 }
  0xd9   :  { %v3520_v47 = vor.u32 %v4604_v38, %v3519_v37  ;;  %v4233_v9 = vld [vmem:[#allocation7 + $0x7bc] sm:$0xf0]  ;;  %v4549_v12 = vld [vmem:[#allocation7 + $0x68] sm:$0xf0]  ;;  %v4213_v22 = vld [vmem:[#allocation7 + $0x794] sm:$0xf0] }
  0xda   :  { %2377 = vmatpush.bf16.msra.mxu1 %v3776_v45  ;;  %2391 = vmatpush.bf16.msra.mxu2 %v3936_v46  ;;  %v4273_v45 = vld [vmem:[#allocation7 + $0x80c] sm:$0xf0]  ;;  %v3360_v46 = vor.u32 %v4564_v36, %v3359_v35  ;;  %v4236_v16 = vor.u32 %v4781_v8, %v4233_v9  ;;  %v3719_v23 = vld [vmem:[#allocation7 + $0x3a0] sm:$0xf]  ;;  %v4654_v24 = vld [vmem:[#allocation7 + $0x3b0] sm:$0xf0] }
  0xdb   :  { %v4694_v28 = vld [vmem:[#allocation7 + $0x4f0] sm:$0xf0]  ;;  %v3279_v29 = vld [vmem:[#allocation7 + $0x30] sm:$0xf]  ;;  %v4544_v30 = vld [vmem:[#allocation7 + $0x40] sm:$0xf0]  ;;  %v3720_v36 = vor.u32 %v4654_v24, %v3719_v23 }
  0xdc   :  { %2351 = vmatpush.bf16.msrb.mxu3 %v3416_v55  ;;  %2365 = vmatpush.bf16.msra.mxu0 %v3576_v56  ;;  %v4276_v55 = vor.u32 %v4791_v44, %v4273_v45  ;;  %v4746_v56 = vld [vmem:[#allocation7 + $0x694] sm:$0xf]  ;;  %v3439_v31 = vld [vmem:[#allocation7 + $0x170] sm:$0xf]  ;;  %v3699_v38 = vld [vmem:[#allocation7 + $0x378] sm:$0xf]  ;;  %v3280_v42 = vor.u32 %v4544_v30, %v3279_v29 }
  0xdd   :  { %v4689_v44 = vld [vmem:[#allocation7 + $0x4c8] sm:$0xf0]  ;;  %v3259_v45 = vld [vmem:[#allocation7 + $0x8] sm:$0xf]  ;;  %v4579_v50 = vld [vmem:[#allocation7 + $0x158] sm:$0xf0] }
  0xde   :  { %2378 = vmatpush.bf16.msra.mxu1 %v3756_v62  ;;  %2392 = vmatpush.bf16.msra.mxu2 %v3916_v63  ;;  %v3319_v62 = vld [vmem:[#allocation7 + $0x80] sm:$0xf]  ;;  %v4554_v63 = vld [vmem:[#allocation7 + $0x90] sm:$0xf0]  ;;  %v4769_v6 = vld [vmem:[#allocation7 + $0x748] sm:$0xf0] }
  0xdf   :  { %2352 = vmatmul.bf16.vlgmr.msrb.gmra.mxu3 %v5157_v49  ;;  %2366 = vmatmul.bf16.vlgmr.msra.gmra.mxu0 %v5169_v20  ;;  %v3320_v57 = vor.u32 %v4554_v63, %v3319_v62  ;;  %v4039_v51 = vld [vmem:[#allocation7 + $0x620] sm:$0xf]  ;;  %v4734_v52 = vld [vmem:[#allocation7 + $0x630] sm:$0xf0]  ;;  %v3839_v63 = vld [vmem:[#allocation7 + $0x490] sm:$0xf] }
  0xe0   :  { %2400 = vmatpush.bf16.msra.mxu3 %v4196_v58  ;;  %2414 = vmatpush.bf16.msrb.mxu0 %v4356_v40  ;;  %v4093_v58 = vld [vmem:[#allocation7 + $0x6a4] sm:$0xf0]  ;;  %v4786_v40 = vld [vmem:[#allocation7 + $0x7d4] sm:$0xf]  ;;  %v4199_v53 = vld [vmem:[#allocation7 + $0x760] sm:$0xf] }
  0xe1   :  { %v4096_v2 = vor.u32 %v4746_v56, %v4093_v58  ;;  %v4256_v3 = vor.u32 %v4786_v40, %v4253_v59  ;;  %v3679_v59 = vld [vmem:[#allocation7 + $0x350] sm:$0xf]  ;;  %v3659_v9 = vld [vmem:[#allocation7 + $0x328] sm:$0xf]  ;;  %v4634_v23 = vld [vmem:[#allocation7 + $0x310] sm:$0xf0] }
  0xe2   :  { %2379 = vmatpush.bf16.msra.mxu1 %v3736_v13  ;;  %2393 = vmatpush.bf16.msra.mxu2 %v3896_v14  ;;  %v3459_v13 = vld [vmem:[#allocation7 + $0x198] sm:$0xf]  ;;  %v4589_v14 = vld [vmem:[#allocation7 + $0x1a8] sm:$0xf0]  ;;  %v4719_v29 = vld [vmem:[#allocation7 + $0x5b8] sm:$0xf0] }
  0xe3   :  { %v4139_v30 = vld [vmem:[#allocation7 + $0x6e8] sm:$0xf] }
  0xe4   :  { %2401 = vmatpush.bf16.msra.mxu3 %v4176_v10  ;;  %2415 = vmatpush.bf16.msrb.mxu0 %v4336_v11  ;;  %v3480_v10 = vor.u32 %v4594_v1, %v3479_v0  ;;  %v3299_v11 = vld [vmem:[#allocation7 + $0x58] sm:$0xf]  ;;  %v4684_v0 = vld [vmem:[#allocation7 + $0x4a0] sm:$0xf0] }
  0xe5   :  { %2380 = vmatmul.bf16.vlgmr.msra.gmra.mxu1 %v5171_v21  ;;  %2394 = vmatmul.bf16.vlgmr.msra.gmra.mxu2 %v5176_v4  ;;  %v3300_v25 = vor.u32 %v4549_v12, %v3299_v11  ;;  %v4019_v1 = vld [vmem:[#allocation7 + $0x5f8] sm:$0xf]  ;;  %v3840_v8 = vor.u32 %v4684_v0, %v3839_v63  ;;  %v3819_v12 = vld [vmem:[#allocation7 + $0x468] sm:$0xf]  ;;  %v4619_v63 = vld [vmem:[#allocation7 + $0x298] sm:$0xf0] }
  0xe6   :  { %2428 = vmatpush.bf16.msrb.mxu1 %v3400_v18  ;;  %2442 = vmatpush.bf16.msrb.mxu2 %v3560_v19  ;;  %v4053_v18 = vld [vmem:[#allocation7 + $0x654] sm:$0xf0]  ;;  %v4776_v19 = vld [vmem:[#allocation7 + $0x784] sm:$0xf]  ;;  %v3739_v0 = vld [vmem:[#allocation7 + $0x3c8] sm:$0xf] }
  0xe7   :  { %v4216_v35 = vor.u32 %v4776_v19, %v4213_v22  ;;  %v3639_v22 = vld [vmem:[#allocation7 + $0x300] sm:$0xf] }
  0xe8   :  { %2402 = vmatpush.bf16.msra.mxu3 %v4156_v26  ;;  %2416 = vmatpush.bf16.msrb.mxu0 %v4316_v27  ;;  %v3460_v26 = vor.u32 %v4589_v14, %v3459_v13  ;;  %v3879_v27 = vld [vmem:[#allocation7 + $0x4e0] sm:$0xf]  ;;  %v4679_v13 = vld [vmem:[#allocation7 + $0x478] sm:$0xf0]  ;;  %v3999_v14 = vld [vmem:[#allocation7 + $0x5d0] sm:$0xf] }
  0xe9   :  { %v3880_v37 = vor.u32 %v4694_v28, %v3879_v27  ;;  %v3820_v19 = vor.u32 %v4679_v13, %v3819_v12  ;;  %v4674_v27 = vld [vmem:[#allocation7 + $0x450] sm:$0xf0]  ;;  %v3979_v28 = vld [vmem:[#allocation7 + $0x5a8] sm:$0xf]  ;;  %v4744_v12 = vld [vmem:[#allocation7 + $0x680] sm:$0xf0] }
  0xea   :  { %2429 = vmatpush.bf16.msrb.mxu1 %v3380_v33  ;;  %2443 = vmatpush.bf16.msrb.mxu2 %v3540_v34  ;;  %v4584_v33 = vld [vmem:[#allocation7 + $0x180] sm:$0xf0]  ;;  %v4056_v34 = vor.u32 %v4736_v17, %v4053_v18 }
  0xeb   :  { %v3440_v43 = vor.u32 %v4584_v33, %v3439_v31  ;;  %v4764_v17 = vld [vmem:[#allocation7 + $0x720] sm:$0xf0]  ;;  %v4759_v31 = vld [vmem:[#allocation7 + $0x6f8] sm:$0xf0]  ;;  %v3640_v33 = vor.u32 %v4634_v23, %v3639_v22 }
  0xec   :  { %2403 = vmatpush.bf16.msra.mxu3 %v4136_v39  ;;  %2417 = vmatpush.bf16.msrb.mxu0 %v4296_v41  ;;  %v4649_v39 = vld [vmem:[#allocation7 + $0x388] sm:$0xf0]  ;;  %v3859_v41 = vld [vmem:[#allocation7 + $0x4b8] sm:$0xf] }
  0xed   :  { %v3860_v56 = vor.u32 %v4689_v44, %v3859_v41  ;;  %v4669_v41 = vld [vmem:[#allocation7 + $0x428] sm:$0xf0]  ;;  %v4119_v44 = vld [vmem:[#allocation7 + $0x6c0] sm:$0xf] }
  0xee   :  { %2430 = vmatpush.bf16.msrb.mxu1 %v3360_v46  ;;  %2444 = vmatpush.bf16.msrb.mxu2 %v3520_v47  ;;  %v4539_v46 = vld [vmem:[#allocation7 + $0x18] sm:$0xf0]  ;;  %v3419_v47 = vld [vmem:[#allocation7 + $0x148] sm:$0xf] }
  0xef   :  { %v3260_v58 = vor.u32 %v4539_v46, %v3259_v45  ;;  %v3420_v40 = vor.u32 %v4579_v50, %v3419_v47  ;;  %v4754_v45 = vld [vmem:[#allocation7 + $0x6d0] sm:$0xf0]  ;;  %v3599_v50 = vld [vmem:[#allocation7 + $0x2b0] sm:$0xf] }
  0xf0   :  { %2404 = vmatpush.bf16.msra.mxu3 %v4116_v54  ;;  %2418 = vmatpush.bf16.msrb.mxu0 %v4276_v55  ;;  %v4774_v54 = vld [vmem:[#allocation7 + $0x770] sm:$0xf0]  ;;  %v3700_v55 = vor.u32 %v4649_v39, %v3699_v38  ;;  %v4140_v38 = vor.u32 %v4759_v31, %v4139_v30  ;;  %v3779_v39 = vld [vmem:[#allocation7 + $0x418] sm:$0xf]  ;;  %v4652_v31 = vld [vmem:[#allocation7 + $0x3a4] sm:$0xf] }
  0xf1   :  { %v4200_v62 = vor.u32 %v4774_v54, %v4199_v53  ;;  %v3780_v47 = vor.u32 %v4669_v41, %v3779_v39  ;;  %v4120_v53 = vor.u32 %v4754_v45, %v4119_v44  ;;  %v3759_v54 = vld [vmem:[#allocation7 + $0x3f0] sm:$0xf]  ;;  %v3561_v30 = vld [vmem:[#allocation7 + $0x274] sm:$0xf0]  ;;  %v4804_v39 = vld [vmem:[#allocation7 + $0x860] sm:$0xf0] }
  0xf2   :  { %2431 = vmatpush.bf16.msrb.mxu1 %v3340_v60  ;;  %2445 = vmatpush.bf16.msrb.mxu2 %v3500_v61  ;;  %v4644_v60 = vld [vmem:[#allocation7 + $0x360] sm:$0xf0]  ;;  %v4040_v61 = vor.u32 %v4734_v52, %v4039_v51  ;;  %v3361_v44 = vld [vmem:[#allocation7 + $0xe4] sm:$0xf0]  ;;  %v4607_v45 = vld [vmem:[#allocation7 + $0x23c] sm:$0xf] }
  0xf3   :  { %v3680_v7 = vor.u32 %v4644_v60, %v3679_v59  ;;  %v4624_v51 = vld [vmem:[#allocation7 + $0x2c0] sm:$0xf0]  ;;  %v4749_v59 = vld [vmem:[#allocation7 + $0x6a8] sm:$0xf0] }
  0xf4   :  { %2405 = vmatpush.bf16.msra.mxu3 %v4096_v2  ;;  %2419 = vmatpush.bf16.msrb.mxu0 %v4256_v3  ;;  %v4729_v2 = vld [vmem:[#allocation7 + $0x608] sm:$0xf0]  ;;  %v4179_v3 = vld [vmem:[#allocation7 + $0x738] sm:$0xf]  ;;  %v3600_v60 = vor.u32 %v4624_v51, %v3599_v50  ;;  %v3701_v50 = vld [vmem:[#allocation7 + $0x38c] sm:$0xf0] }
  0xf5   :  { %v4180_v11 = vor.u32 %v4769_v6, %v4179_v3  ;;  %v4659_v3 = vld [vmem:[#allocation7 + $0x3d8] sm:$0xf0]  ;;  %v4359_v6 = vld [vmem:[#allocation7 + $0x8a0] sm:$0xf] }
  0xf6   :  { %2432 = vmatpush.bf16.msrb.mxu1 %v3320_v57  ;;  %2446 = vmatpush.bf16.msrb.mxu2 %v3480_v10  ;;  %v4639_v57 = vld [vmem:[#allocation7 + $0x338] sm:$0xf0]  ;;  %v4020_v10 = vor.u32 %v4729_v2, %v4019_v1 }
  0xf7   :  { %v3660_v18 = vor.u32 %v4639_v57, %v3659_v9  ;;  %v3401_v9 = vld [vmem:[#allocation7 + $0x134] sm:$0xf0]  ;;  %v3919_v57 = vld [vmem:[#allocation7 + $0x530] sm:$0xf] }
  0xf8   :  { %2406 = vmatpush.bf16.msra.mxu3 %v4076_v15  ;;  %2420 = vmatpush.bf16.msrb.mxu0 %v4236_v16  ;;  %v4724_v15 = vld [vmem:[#allocation7 + $0x5e0] sm:$0xf0]  ;;  %v4159_v16 = vld [vmem:[#allocation7 + $0x710] sm:$0xf] }
  0xf9   :  { %v4000_v24 = vor.u32 %v4724_v15, %v3999_v14  ;;  %v3740_v14 = vor.u32 %v4659_v3, %v3739_v0 }
  0xfa   :  { %2433 = vmatpush.bf16.msrb.mxu1 %v3300_v25  ;;  %2447 = vmatpush.bf16.msrb.mxu2 %v3460_v26  ;;  %v4160_v25 = vor.u32 %v4764_v17, %v4159_v16  ;;  %v3799_v26 = vld [vmem:[#allocation7 + $0x440] sm:$0xf]  ;;  %v4339_v17 = vld [vmem:[#allocation7 + $0x878] sm:$0xf] }
  0xfc   :  { %2407 = vmatpush.bf16.msra.mxu3 %v4056_v34  ;;  %2421 = vmatpush.bf16.msrb.mxu0 %v4216_v35  ;;  %v3800_v34 = vor.u32 %v4674_v27, %v3799_v26  ;;  %v3619_v35 = vld [vmem:[#allocation7 + $0x2d8] sm:$0xf]  ;;  %v4699_v26 = vld [vmem:[#allocation7 + $0x518] sm:$0xf0]  ;;  %v4059_v27 = vld [vmem:[#allocation7 + $0x648] sm:$0xf] }
  0xfe   :  { %2434 = vmatpush.bf16.msrb.mxu1 %v3280_v42  ;;  %2448 = vmatpush.bf16.msrb.mxu2 %v3440_v43  ;;  %v3959_v42 = vld [vmem:[#allocation7 + $0x580] sm:$0xf]  ;;  %v4714_v43 = vld [vmem:[#allocation7 + $0x590] sm:$0xf0] }
  0xff   :  { %2408 = vmatmul.bf16.vlgmr.msra.gmra.mxu3 %v5178_v5  ;;  %2422 = vmatmul.bf16.vlgmr.msrb.gmra.mxu0 %v5182_v32  ;;  %v3960_v52 = vor.u32 %v4714_v43, %v3959_v42  ;;  %v4562_v43 = vld [vmem:[#allocation7 + $0xd4] sm:$0xf] }
 0x100   :  { %2456 = vmatpush.bf16.msrb.mxu3 %v3720_v36  ;;  %2470 = vmatpush.bf16.msra.mxu0 %v3880_v37  ;;  %v4629_v36 = vld [vmem:[#allocation7 + $0x2e8] sm:$0xf0]  ;;  %v3980_v37 = vor.u32 %v4719_v29, %v3979_v28  ;;  %v4739_v28 = vld [vmem:[#allocation7 + $0x658] sm:$0xf0]  ;;  %v4612_v29 = vld [vmem:[#allocation7 + $0x264] sm:$0xf] }
 0x101   :  { %v3620_v46 = vor.u32 %v4629_v36, %v3619_v35  ;;  %v3564_v41 = vor.u32 %v4612_v29, %v3561_v30  ;;  %v4784_v29 = vld [vmem:[#allocation7 + $0x7c0] sm:$0xf0] }
 0x102   :  { %2435 = vmatpush.bf16.msrb.mxu1 %v3260_v58  ;;  %2449 = vmatpush.bf16.msrb.mxu2 %v3420_v40  ;;  %v4709_v58 = vld [vmem:[#allocation7 + $0x568] sm:$0xf0]  ;;  %v4099_v40 = vld [vmem:[#allocation7 + $0x698] sm:$0xf] }
 0x103   :  { %v4100_v2 = vor.u32 %v4749_v59, %v4099_v40  ;;  %v3341_v40 = vld [vmem:[#allocation7 + $0xbc] sm:$0xf0]  ;;  %v4602_v59 = vld [vmem:[#allocation7 + $0x214] sm:$0xf] }
 0x104   :  { %2457 = vmatpush.bf16.msrb.mxu3 %v3700_v55  ;;  %2471 = vmatpush.bf16.msra.mxu0 %v3860_v56  ;;  %v4664_v55 = vld [vmem:[#allocation7 + $0x400] sm:$0xf0]  ;;  %v3939_v56 = vld [vmem:[#allocation7 + $0x558] sm:$0xf] }
 0x105   :  { %2436 = vmatmul.bf16.vlgmr.msrb.gmra.mxu1 %v5155_v48  ;;  %2450 = vmatmul.bf16.vlgmr.msrb.gmra.mxu2 %v5157_v49  ;;  %v3940_v1 = vor.u32 %v4709_v58, %v3939_v56  ;;  %v4557_v58 = vld [vmem:[#allocation7 + $0xac] sm:$0xf] }
 0x106   :  { %2484 = vmatpush.bf16.msra.mxu1 %v4040_v61  ;;  %2498 = vmatpush.bf16.msra.mxu2 %v4200_v62  ;;  %v3760_v61 = vor.u32 %v4664_v55, %v3759_v54  ;;  %v3579_v62 = vld [vmem:[#allocation7 + $0x288] sm:$0xf]  ;;  %v4799_v54 = vld [vmem:[#allocation7 + $0x838] sm:$0xf0]  ;;  %v3344_v0 = vor.u32 %v4557_v58, %v3341_v40 }
 0x107   :  { %v3580_v13 = vor.u32 %v4619_v63, %v3579_v62  ;;  %v3681_v62 = vld [vmem:[#allocation7 + $0x364] sm:$0xf0] }
 0x108   :  { %2458 = vmatpush.bf16.msrb.mxu3 %v3680_v7  ;;  %2472 = vmatpush.bf16.msra.mxu0 %v3840_v8  ;;  %v4814_v7 = vld [vmem:[#allocation7 + $0x8b0] sm:$0xf0]  ;;  %v4572_v8 = vld [vmem:[#allocation7 + $0x124] sm:$0xf]  ;;  %v3601_v58 = vld [vmem:[#allocation7 + $0x2c4] sm:$0xf0] }
 0x109   :  { %v4360_v15 = vor.u32 %v4814_v7, %v4359_v6  ;;  %v3404_v16 = vor.u32 %v4572_v8, %v3401_v9  ;;  %v4552_v7 = vld [vmem:[#allocation7 + $0x84] sm:$0xf]  ;;  %v3321_v8 = vld [vmem:[#allocation7 + $0x94] sm:$0xf0]  ;;  %v4597_v9 = vld [vmem:[#allocation7 + $0x1ec] sm:$0xf] }
 0x10a   :  { %2485 = vmatpush.bf16.msra.mxu1 %v4020_v10  ;;  %2499 = vmatpush.bf16.msra.mxu2 %v4180_v11  ;;  %v4704_v10 = vld [vmem:[#allocation7 + $0x540] sm:$0xf0]  ;;  %v4079_v11 = vld [vmem:[#allocation7 + $0x670] sm:$0xf] }
 0x10b   :  { %v3920_v22 = vor.u32 %v4704_v10, %v3919_v57  ;;  %v4080_v23 = vor.u32 %v4744_v12, %v4079_v11  ;;  %v3501_v57 = vld [vmem:[#allocation7 + $0x1fc] sm:$0xf0]  ;;  %v4637_v10 = vld [vmem:[#allocation7 + $0x32c] sm:$0xf] }
 0x10c   :  { %2459 = vmatpush.bf16.msrb.mxu3 %v3660_v18  ;;  %2473 = vmatpush.bf16.msra.mxu0 %v3820_v19  ;;  %v4809_v18 = vld [vmem:[#allocation7 + $0x888] sm:$0xf0]  ;;  %v4567_v19 = vld [vmem:[#allocation7 + $0xfc] sm:$0xf]  ;;  %v3661_v11 = vld [vmem:[#allocation7 + $0x33c] sm:$0xf0] }
 0x10e   :  { %2486 = vmatpush.bf16.msra.mxu1 %v4000_v24  ;;  %2500 = vmatpush.bf16.msra.mxu2 %v4160_v25  ;;  %v3381_v24 = vld [vmem:[#allocation7 + $0x10c] sm:$0xf0]  ;;  %v3899_v25 = vld [vmem:[#allocation7 + $0x508] sm:$0xf] }
 0x10f   :  { %v3384_v35 = vor.u32 %v4567_v19, %v3381_v24  ;;  %v3900_v36 = vor.u32 %v4699_v26, %v3899_v25  ;;  %v3301_v19 = vld [vmem:[#allocation7 + $0x6c] sm:$0xf0]  ;;  %v4632_v24 = vld [vmem:[#allocation7 + $0x304] sm:$0xf]  ;;  %v3641_v25 = vld [vmem:[#allocation7 + $0x314] sm:$0xf0] }
 0x110   :  { %2460 = vmatpush.bf16.msrb.mxu3 %v3640_v33  ;;  %2474 = vmatpush.bf16.msra.mxu0 %v3800_v34  ;;  %v3721_v33 = vld [vmem:[#allocation7 + $0x3b4] sm:$0xf0]  ;;  %v4340_v34 = vor.u32 %v4809_v18, %v4339_v17  ;;  %v3664_v17 = vor.u32 %v4637_v10, %v3661_v11  ;;  %v4547_v18 = vld [vmem:[#allocation7 + $0x5c] sm:$0xf]  ;;  %v4812_v11 = vld [vmem:[#allocation7 + $0x8a4] sm:$0xf] }
 0x111   :  { %v3724_v42 = vor.u32 %v4652_v31, %v3721_v33  ;;  %v3644_v31 = vor.u32 %v4632_v24, %v3641_v25  ;;  %v4542_v33 = vld [vmem:[#allocation7 + $0x34] sm:$0xf]  ;;  %v4201_v10 = vld [vmem:[#allocation7 + $0x774] sm:$0xf0]  ;;  %v4001_v24 = vld [vmem:[#allocation7 + $0x5e4] sm:$0xf0] }
 0x112   :  { %2487 = vmatpush.bf16.msra.mxu1 %v3980_v37  ;;  %2501 = vmatpush.bf16.msra.mxu2 %v4140_v38  ;;  %v4060_v37 = vor.u32 %v4739_v28, %v4059_v27  ;;  %v4319_v38 = vld [vmem:[#allocation7 + $0x850] sm:$0xf]  ;;  %v3304_v27 = vor.u32 %v4547_v18, %v3301_v19  ;;  %v3841_v18 = vld [vmem:[#allocation7 + $0x4a4] sm:$0xf0]  ;;  %v4767_v25 = vld [vmem:[#allocation7 + $0x73c] sm:$0xf] }
 0x113   :  { %v4320_v51 = vor.u32 %v4804_v39, %v4319_v38  ;;  %v4239_v28 = vld [vmem:[#allocation7 + $0x7b0] sm:$0xf] }
 0x114   :  { %2461 = vmatpush.bf16.msrb.mxu3 %v3620_v46  ;;  %2475 = vmatpush.bf16.msra.mxu0 %v3780_v47  ;;  %v3541_v46 = vld [vmem:[#allocation7 + $0x24c] sm:$0xf0]  ;;  %v4647_v47 = vld [vmem:[#allocation7 + $0x37c] sm:$0xf]  ;;  %v4240_v39 = vor.u32 %v4784_v29, %v4239_v28 }
 0x115   :  { %v3544_v55 = vor.u32 %v4607_v45, %v3541_v46  ;;  %v3704_v56 = vor.u32 %v4647_v47, %v3701_v50  ;;  %v3621_v38 = vld [vmem:[#allocation7 + $0x2ec] sm:$0xf0]  ;;  %v3261_v47 = vld [vmem:[#allocation7 + $0x1c] sm:$0xf0]  ;;  %v4692_v50 = vld [vmem:[#allocation7 + $0x4e4] sm:$0xf] }
 0x116   :  { %2488 = vmatpush.bf16.msra.mxu1 %v3960_v52  ;;  %2502 = vmatpush.bf16.msra.mxu2 %v4120_v53  ;;  %v3364_v52 = vor.u32 %v4562_v43, %v3361_v44  ;;  %v4299_v53 = vld [vmem:[#allocation7 + $0x828] sm:$0xf]  ;;  %v4779_v43 = vld [vmem:[#allocation7 + $0x798] sm:$0xf0]  ;;  %v4537_v44 = vld [vmem:[#allocation7 + $0xc] sm:$0xf] }
 0x117   :  { %v4300_v63 = vor.u32 %v4799_v54, %v4299_v53  ;;  %v4041_v53 = vld [vmem:[#allocation7 + $0x634] sm:$0xf0]  ;;  %v4582_v54 = vld [vmem:[#allocation7 + $0x174] sm:$0xf]  ;;  %v4341_v28 = vld [vmem:[#allocation7 + $0x88c] sm:$0xf0] }
 0x118   :  { %2462 = vmatpush.bf16.msrb.mxu3 %v3600_v60  ;;  %2476 = vmatpush.bf16.msra.mxu0 %v3760_v61  ;;  %v3521_v60 = vld [vmem:[#allocation7 + $0x224] sm:$0xf0]  ;;  %v4642_v61 = vld [vmem:[#allocation7 + $0x354] sm:$0xf] }
 0x119   :  { %v3524_v3 = vor.u32 %v4602_v59, %v3521_v60  ;;  %v3684_v6 = vor.u32 %v4642_v61, %v3681_v62  ;;  %v3264_v59 = vor.u32 %v4537_v44, %v3261_v47  ;;  %v4687_v62 = vld [vmem:[#allocation7 + $0x4bc] sm:$0xf] }
 0x11a   :  { %2489 = vmatpush.bf16.msra.mxu1 %v3940_v1  ;;  %2503 = vmatpush.bf16.msra.mxu2 %v4100_v2  ;;  %v4279_v1 = vld [vmem:[#allocation7 + $0x800] sm:$0xf]  ;;  %v4794_v2 = vld [vmem:[#allocation7 + $0x810] sm:$0xf0] }
 0x11b   :  { %v4280_v12 = vor.u32 %v4794_v2, %v4279_v1 }
 0x11c   :  { %2463 = vmatpush.bf16.msrb.mxu3 %v3580_v13  ;;  %2477 = vmatpush.bf16.msra.mxu0 %v3740_v14  ;;  %v3324_v13 = vor.u32 %v4552_v7, %v3321_v8  ;;  %v4259_v14 = vld [vmem:[#allocation7 + $0x7d8] sm:$0xf]  ;;  %v3421_v7 = vld [vmem:[#allocation7 + $0x15c] sm:$0xf0]  ;;  %v4617_v8 = vld [vmem:[#allocation7 + $0x28c] sm:$0xf] }
 0x11e   :  { %2490 = vmatpush.bf16.msra.mxu1 %v3920_v22  ;;  %2504 = vmatpush.bf16.msra.mxu2 %v4080_v23  ;;  %v4592_v22 = vld [vmem:[#allocation7 + $0x1c4] sm:$0xf]  ;;  %v3481_v23 = vld [vmem:[#allocation7 + $0x1d4] sm:$0xf0] }
 0x11f   :  { %2464 = vmatmul.bf16.vlgmr.msrb.gmra.mxu3 %v5169_v20  ;;  %2478 = vmatmul.bf16.vlgmr.msra.gmra.mxu0 %v5171_v21  ;;  %v3484_v30 = vor.u32 %v4592_v22, %v3481_v23  ;;  %v4722_v23 = vld [vmem:[#allocation7 + $0x5d4] sm:$0xf] }
 0x120   :  { %2512 = vmatpush.bf16.msra.mxu3 %v4360_v15  ;;  %2526 = vmatpush.bf16.msrb.mxu0 %v3404_v16  ;;  %v4789_v15 = vld [vmem:[#allocation7 + $0x7e8] sm:$0xf0]  ;;  %v3504_v16 = vor.u32 %v4597_v9, %v3501_v57  ;;  %v3581_v9 = vld [vmem:[#allocation7 + $0x29c] sm:$0xf0]  ;;  %v4772_v57 = vld [vmem:[#allocation7 + $0x764] sm:$0xf] }
 0x121   :  { %v4260_v26 = vor.u32 %v4789_v15, %v4259_v14  ;;  %v4204_v19 = vor.u32 %v4772_v57, %v4201_v10  ;;  %v4662_v10 = vld [vmem:[#allocation7 + $0x3f4] sm:$0xf] }
 0x122   :  { %2491 = vmatpush.bf16.msra.mxu1 %v3900_v36  ;;  %2505 = vmatpush.bf16.msra.mxu2 %v4060_v37  ;;  %v3461_v36 = vld [vmem:[#allocation7 + $0x1ac] sm:$0xf0]  ;;  %v4627_v37 = vld [vmem:[#allocation7 + $0x2dc] sm:$0xf] }
 0x123   :  { %v3624_v46 = vor.u32 %v4627_v37, %v3621_v38  ;;  %v3981_v37 = vld [vmem:[#allocation7 + $0x5bc] sm:$0xf0]  ;;  %v4762_v38 = vld [vmem:[#allocation7 + $0x714] sm:$0xf] }
 0x124   :  { %2513 = vmatpush.bf16.msra.mxu3 %v4340_v34  ;;  %2527 = vmatpush.bf16.msrb.mxu0 %v3384_v35  ;;  %v3281_v34 = vld [vmem:[#allocation7 + $0x44] sm:$0xf0]  ;;  %v4587_v35 = vld [vmem:[#allocation7 + $0x19c] sm:$0xf] }
 0x125   :  { %2492 = vmatmul.bf16.vlgmr.msra.gmra.mxu1 %v5176_v4  ;;  %2506 = vmatmul.bf16.vlgmr.msra.gmra.mxu2 %v5178_v5  ;;  %v3464_v45 = vor.u32 %v4587_v35, %v3461_v36  ;;  %v4717_v36 = vld [vmem:[#allocation7 + $0x5ac] sm:$0xf] }
 0x126   :  { %2540 = vmatpush.bf16.msrb.mxu1 %v3564_v41  ;;  %2554 = vmatpush.bf16.msrb.mxu2 %v3724_v42  ;;  %v3284_v41 = vor.u32 %v4542_v33, %v3281_v34  ;;  %v4219_v42 = vld [vmem:[#allocation7 + $0x788] sm:$0xf]  ;;  %v3821_v33 = vld [vmem:[#allocation7 + $0x47c] sm:$0xf0]  ;;  %v3984_v44 = vor.u32 %v4717_v36, %v3981_v37 }
 0x127   :  { %v4220_v40 = vor.u32 %v4779_v43, %v4219_v42  ;;  %v4321_v42 = vld [vmem:[#allocation7 + $0x864] sm:$0xf0] }
 0x128   :  { %2514 = vmatpush.bf16.msra.mxu3 %v4320_v51  ;;  %2528 = vmatpush.bf16.msrb.mxu0 %v3364_v52  ;;  %v3881_v51 = vld [vmem:[#allocation7 + $0x4f4] sm:$0xf0]  ;;  %v4732_v52 = vld [vmem:[#allocation7 + $0x624] sm:$0xf]  ;;  %v4081_v37 = vld [vmem:[#allocation7 + $0x684] sm:$0xf0] }
 0x129   :  { %v3884_v60 = vor.u32 %v4692_v50, %v3881_v51  ;;  %v4044_v61 = vor.u32 %v4732_v52, %v4041_v53  ;;  %v4712_v51 = vld [vmem:[#allocation7 + $0x584] sm:$0xf]  ;;  %v3961_v52 = vld [vmem:[#allocation7 + $0x594] sm:$0xf0]  ;;  %v4757_v53 = vld [vmem:[#allocation7 + $0x6ec] sm:$0xf] }
 0x12a   :  { %2541 = vmatpush.bf16.msrb.mxu1 %v3544_v55  ;;  %2555 = vmatpush.bf16.msrb.mxu2 %v3704_v56  ;;  %v3441_v55 = vld [vmem:[#allocation7 + $0x184] sm:$0xf0]  ;;  %v4622_v56 = vld [vmem:[#allocation7 + $0x2b4] sm:$0xf] }
 0x12b   :  { %v3444_v1 = vor.u32 %v4582_v54, %v3441_v55  ;;  %v3604_v2 = vor.u32 %v4622_v56, %v3601_v58  ;;  %v4141_v54 = vld [vmem:[#allocation7 + $0x6fc] sm:$0xf0]  ;;  %v4797_v55 = vld [vmem:[#allocation7 + $0x82c] sm:$0xf] }
 0x12c   :  { %2515 = vmatpush.bf16.msra.mxu3 %v4300_v63  ;;  %2529 = vmatpush.bf16.msrb.mxu0 %v3344_v0  ;;  %v3861_v63 = vld [vmem:[#allocation7 + $0x4cc] sm:$0xf0]  ;;  %v4727_v0 = vld [vmem:[#allocation7 + $0x5fc] sm:$0xf]  ;;  %v4301_v56 = vld [vmem:[#allocation7 + $0x83c] sm:$0xf0] }
 0x12e   :  { %2542 = vmatpush.bf16.msrb.mxu1 %v3524_v3  ;;  %2556 = vmatpush.bf16.msrb.mxu2 %v3684_v6  ;;  %v4021_v3 = vld [vmem:[#allocation7 + $0x60c] sm:$0xf0]  ;;  %v4577_v6 = vld [vmem:[#allocation7 + $0x14c] sm:$0xf] }
 0x12f   :  { %v4024_v14 = vor.u32 %v4727_v0, %v4021_v3  ;;  %v3424_v15 = vor.u32 %v4577_v6, %v3421_v7  ;;  %v3941_v0 = vld [vmem:[#allocation7 + $0x56c] sm:$0xf0]  ;;  %v4121_v6 = vld [vmem:[#allocation7 + $0x6d4] sm:$0xf0]  ;;  %v4792_v7 = vld [vmem:[#allocation7 + $0x804] sm:$0xf] }
 0x130   :  { %2516 = vmatpush.bf16.msra.mxu3 %v4280_v12  ;;  %2530 = vmatpush.bf16.msrb.mxu0 %v3324_v13  ;;  %v4361_v12 = vld [vmem:[#allocation7 + $0x8b4] sm:$0xf0]  ;;  %v3864_v13 = vor.u32 %v4687_v62, %v3861_v63  ;;  %v4304_v62 = vor.u32 %v4797_v55, %v4301_v56  ;;  %v4707_v63 = vld [vmem:[#allocation7 + $0x55c] sm:$0xf]  ;;  %v4610_v55 = vld [vmem:[#allocation7 + $0x250] sm:$0xf0] }
 0x131   :  { %v4364_v22 = vor.u32 %v4812_v11, %v4361_v12  ;;  %v3944_v57 = vor.u32 %v4707_v63, %v3941_v0  ;;  %v3761_v11 = vld [vmem:[#allocation7 + $0x404] sm:$0xf0]  ;;  %v4737_v56 = vld [vmem:[#allocation7 + $0x64c] sm:$0xf]  ;;  %v4695_v63 = vld [vmem:[#allocation7 + $0x4f8] sm:$0xf0] }
 0x132   :  { %2543 = vmatpush.bf16.msrb.mxu1 %v3504_v16  ;;  %2557 = vmatpush.bf16.msrb.mxu2 %v3664_v17  ;;  %v3584_v16 = vor.u32 %v4617_v8, %v3581_v9  ;;  %v4682_v17 = vld [vmem:[#allocation7 + $0x494] sm:$0xf]  ;;  %v4281_v8 = vld [vmem:[#allocation7 + $0x814] sm:$0xf0] }
 0x133   :  { %v3844_v29 = vor.u32 %v4682_v17, %v3841_v18  ;;  %v4101_v17 = vld [vmem:[#allocation7 + $0x6ac] sm:$0xf0]  ;;  %v4787_v18 = vld [vmem:[#allocation7 + $0x7dc] sm:$0xf] }
 0x134   :  { %2517 = vmatpush.bf16.msra.mxu3 %v4260_v26  ;;  %2531 = vmatpush.bf16.msrb.mxu0 %v3304_v27  ;;  %v4181_v26 = vld [vmem:[#allocation7 + $0x74c] sm:$0xf0]  ;;  %v4807_v27 = vld [vmem:[#allocation7 + $0x87c] sm:$0xf] }
 0x135   :  { %v4184_v34 = vor.u32 %v4767_v25, %v4181_v26  ;;  %v4344_v35 = vor.u32 %v4807_v27, %v4341_v28  ;;  %v3741_v25 = vld [vmem:[#allocation7 + $0x3dc] sm:$0xf0]  ;;  %v4697_v26 = vld [vmem:[#allocation7 + $0x50c] sm:$0xf] }
 0x136   :  { %2544 = vmatpush.bf16.msrb.mxu1 %v3484_v30  ;;  %2558 = vmatpush.bf16.msrb.mxu2 %v3644_v31  ;;  %v4004_v30 = vor.u32 %v4722_v23, %v4001_v24  ;;  %v4677_v31 = vld [vmem:[#allocation7 + $0x46c] sm:$0xf] }
 0x137   :  { %v3824_v43 = vor.u32 %v4677_v31, %v3821_v33  ;;  %v4657_v24 = vld [vmem:[#allocation7 + $0x3cc] sm:$0xf]  ;;  %v4575_v31 = vld [vmem:[#allocation7 + $0x138] sm:$0xf0]  ;;  %v3567_v33 = vld [vmem:[#allocation7 + $0x268] sm:$0xf] }
 0x138   :  { %2518 = vmatpush.bf16.msra.mxu3 %v4240_v39  ;;  %2532 = vmatpush.bf16.msrb.mxu0 %v3284_v41  ;;  %v4161_v39 = vld [vmem:[#allocation7 + $0x724] sm:$0xf0]  ;;  %v4802_v41 = vld [vmem:[#allocation7 + $0x854] sm:$0xf] }
 0x139   :  { %v4164_v47 = vor.u32 %v4762_v38, %v4161_v39  ;;  %v4324_v50 = vor.u32 %v4802_v41, %v4321_v42  ;;  %v4782_v38 = vld [vmem:[#allocation7 + $0x7b4] sm:$0xf]  ;;  %v4241_v39 = vld [vmem:[#allocation7 + $0x7c4] sm:$0xf0] }
 0x13a   :  { %2545 = vmatpush.bf16.msrb.mxu1 %v3464_v45  ;;  %2559 = vmatpush.bf16.msrb.mxu2 %v3624_v46  ;;  %v4672_v45 = vld [vmem:[#allocation7 + $0x444] sm:$0xf]  ;;  %v3801_v46 = vld [vmem:[#allocation7 + $0x454] sm:$0xf0] }
 0x13b   :  { %v3804_v58 = vor.u32 %v4672_v45, %v3801_v46 }
 0x13c   :  { %2519 = vmatpush.bf16.msra.mxu3 %v4220_v40  ;;  %2533 = vmatpush.bf16.msrb.mxu0 %v3264_v59  ;;  %v3964_v40 = vor.u32 %v4712_v51, %v3961_v52  ;;  %v4667_v59 = vld [vmem:[#allocation7 + $0x41c] sm:$0xf]  ;;  %v3547_v51 = vld [vmem:[#allocation7 + $0x240] sm:$0xf] }
 0x13e   :  { %2546 = vmatpush.bf16.msrb.mxu1 %v3444_v1  ;;  %2560 = vmatpush.bf16.msrb.mxu2 %v3604_v2  ;;  %v4752_v1 = vld [vmem:[#allocation7 + $0x6c4] sm:$0xf]  ;;  %v5202_v2 = vpop.f32.mrf.mxu0 }
 0x13f   :  { %2520 = vmatmul.bf16.vlgmr.msra.gmra.mxu3 %v5182_v32  ;;  %2534 = vmatmul.bf16.vlgmr.msrb.gmra.mxu0 %v5155_v48  ;;  %v4124_v12 = vor.u32 %v4752_v1, %v4121_v6  ;;  %v3548_v1 = vor.u32 %v4610_v55, %v3547_v51  ;;  %v4640_v51 = vld [vmem:[#allocation7 + $0x340] sm:$0xf0] }
 0x140   :  { %2568 = vmatpush.bf16.msrb.mxu3 %v3884_v60  ;;  %2582 = vmatpush.bf16.msra.mxu0 %v4044_v61  ;;  %v3781_v60 = vld [vmem:[#allocation7 + $0x42c] sm:$0xf0]  ;;  %v4144_v61 = vor.u32 %v4757_v53, %v4141_v54  ;;  %v4244_v54 = vor.u32 %v4782_v38, %v4241_v39  ;;  %v3327_v39 = vld [vmem:[#allocation7 + $0x88] sm:$0xf] }
 0x141   :  { %v5204_v3 = vpop.f32.mrf.mxu3  ;;  %v3784_v9 = vor.u32 %v4667_v59, %v3781_v60  ;;  %v4221_v59 = vld [vmem:[#allocation7 + $0x79c] sm:$0xf0]  ;;  %v3727_v60 = vld [vmem:[#allocation7 + $0x3a8] sm:$0xf] }
 0x142   :  { %2547 = vmatpush.bf16.msrb.mxu1 %v3424_v15  ;;  %2561 = vmatpush.bf16.msrb.mxu2 %v3584_v16  ;;  %v3921_v15 = vld [vmem:[#allocation7 + $0x544] sm:$0xf0]  ;;  %v4747_v16 = vld [vmem:[#allocation7 + $0x69c] sm:$0xf]  ;;  %v5206_v36 = vpop.f32.mrf.mxu1 }
 0x143   :  { %v4104_v27 = vor.u32 %v4747_v16, %v4101_v17  ;;  %v4690_v16 = vld [vmem:[#allocation7 + $0x4d0] sm:$0xf0] }
 0x144   :  { %2569 = vmatpush.bf16.msrb.mxu3 %v3864_v13  ;;  %2583 = vmatpush.bf16.msra.mxu0 %v4024_v14  ;;  %v4284_v13 = vor.u32 %v4792_v7, %v4281_v8  ;;  %v4702_v14 = vld [vmem:[#allocation7 + $0x534] sm:$0xf]  ;;  %v3367_v8 = vld [vmem:[#allocation7 + $0xd8] sm:$0xf] }
 0x145   :  { %2548 = vmatmul.bf16.vlgmr.msrb.gmra.mxu1 %v5157_v49  ;;  %2562 = vmatmul.bf16.vlgmr.msrb.gmra.mxu2 %v5169_v20  ;;  %v3924_v23 = vor.u32 %v4702_v14, %v3921_v15  ;;  %v4650_v14 = vld [vmem:[#allocation7 + $0x390] sm:$0xf0]  ;;  %v3867_v15 = vld [vmem:[#allocation7 + $0x4c0] sm:$0xf] }
 0x146   :  { %2596 = vmatpush.bf16.msra.mxu1 %v4204_v19  ;;  %2610 = vmatpush.bf16.msra.mxu2 %v4364_v22  ;;  %v4261_v19 = vld [vmem:[#allocation7 + $0x7ec] sm:$0xf0]  ;;  %v3764_v22 = vor.u32 %v4662_v10, %v3761_v11  ;;  %v5208_v41 = vpop.f32.mrf.mxu0  ;;  %v3527_v11 = vld [vmem:[#allocation7 + $0x218] sm:$0xf] }
 0x147   :  { %v4264_v28 = vor.u32 %v4787_v18, %v4261_v19 }
 0x148   :  { %2570 = vmatpush.bf16.msrb.mxu3 %v3844_v29  ;;  %2584 = vmatpush.bf16.msra.mxu0 %v4004_v30  ;;  %v3901_v29 = vld [vmem:[#allocation7 + $0x51c] sm:$0xf0]  ;;  %v3407_v30 = vld [vmem:[#allocation7 + $0x128] sm:$0xf]  ;;  %v5212_v52 = vpop.f32.mrf.mxu2 }
 0x149   :  { %v5210_v42 = vpop.f32.mrf.mxu3  ;;  %v3408_v45 = vor.u32 %v4575_v31, %v3407_v30  ;;  %v3687_v30 = vld [vmem:[#allocation7 + $0x358] sm:$0xf] }
 0x14a   :  { %2597 = vmatpush.bf16.msra.mxu1 %v4184_v34  ;;  %2611 = vmatpush.bf16.msra.mxu2 %v4344_v35  ;;  %v4615_v34 = vld [vmem:[#allocation7 + $0x278] sm:$0xf0]  ;;  %v4742_v35 = vld [vmem:[#allocation7 + $0x674] sm:$0xf]  ;;  %v5216_v17 = vpop.f32.mrf.mxu1 }
 0x14b   :  { %v3568_v46 = vor.u32 %v4615_v34, %v3567_v33  ;;  %v4084_v53 = vor.u32 %v4742_v35, %v4081_v37  ;;  %v4645_v33 = vld [vmem:[#allocation7 + $0x368] sm:$0xf0]  ;;  %v3847_v34 = vld [vmem:[#allocation7 + $0x498] sm:$0xf] }
 0x14c   :  { %2571 = vmatpush.bf16.msrb.mxu3 %v3824_v43  ;;  %2585 = vmatpush.bf16.msra.mxu0 %v3984_v44  ;;  %v3744_v43 = vor.u32 %v4657_v24, %v3741_v25  ;;  %v3904_v44 = vor.u32 %v4697_v26, %v3901_v29  ;;  %v3347_v24 = vld [vmem:[#allocation7 + $0xb0] sm:$0xf]  ;;  %v4560_v25 = vld [vmem:[#allocation7 + $0xc0] sm:$0xf0]  ;;  %v4685_v35 = vld [vmem:[#allocation7 + $0x4a8] sm:$0xf0] }
 0x14d   :  { %v4600_v29 = vld [vmem:[#allocation7 + $0x200] sm:$0xf0]  ;;  %v3348_v37 = vor.u32 %v4560_v25, %v3347_v24  ;;  %v4630_v24 = vld [vmem:[#allocation7 + $0x2f0] sm:$0xf0]  ;;  %v3787_v25 = vld [vmem:[#allocation7 + $0x420] sm:$0xf] }
 0x14e   :  { %2598 = vmatpush.bf16.msra.mxu1 %v4164_v47  ;;  %2612 = vmatpush.bf16.msra.mxu2 %v4324_v50  ;;  %v3387_v47 = vld [vmem:[#allocation7 + $0x100] sm:$0xf]  ;;  %v4570_v50 = vld [vmem:[#allocation7 + $0x110] sm:$0xf0]  ;;  %v5218_v18 = vpop.f32.mrf.mxu0 }
 0x14f   :  { %v3388_v0 = vor.u32 %v4570_v50, %v3387_v47  ;;  %v4595_v47 = vld [vmem:[#allocation7 + $0x1d8] sm:$0xf0]  ;;  %v3667_v50 = vld [vmem:[#allocation7 + $0x330] sm:$0xf] }
 0x150   :  { %2572 = vmatpush.bf16.msrb.mxu3 %v3804_v58  ;;  %2586 = vmatpush.bf16.msra.mxu0 %v3964_v40  ;;  %v4061_v58 = vld [vmem:[#allocation7 + $0x65c] sm:$0xf0]  ;;  %v4777_v40 = vld [vmem:[#allocation7 + $0x78c] sm:$0xf]  ;;  %v5222_v31 = vpop.f32.mrf.mxu2 }
 0x151   :  { %v4064_v6 = vor.u32 %v4737_v56, %v4061_v58  ;;  %v4224_v7 = vor.u32 %v4777_v40, %v4221_v59  ;;  %v3307_v58 = vld [vmem:[#allocation7 + $0x60] sm:$0xf]  ;;  %v4550_v40 = vld [vmem:[#allocation7 + $0x70] sm:$0xf0] }
 0x152   :  { %2599 = vmatpush.bf16.msra.mxu1 %v4144_v61  ;;  %2613 = vmatpush.bf16.msra.mxu2 %v4304_v62  ;;  %v4655_v61 = vld [vmem:[#allocation7 + $0x3b8] sm:$0xf0]  ;;  %v3887_v62 = vld [vmem:[#allocation7 + $0x4e8] sm:$0xf]  ;;  %v5220_v19 = vpop.f32.mrf.mxu3  ;;  %v5226_v59 = vpop.f32.mrf.mxu1 }
 0x153   :  { %v3888_v10 = vor.u32 %v4695_v63, %v3887_v62  ;;  %v3467_v62 = vld [vmem:[#allocation7 + $0x1a0] sm:$0xf]  ;;  %v4590_v63 = vld [vmem:[#allocation7 + $0x1b0] sm:$0xf0] }
 0x154   :  { %2573 = vmatpush.bf16.msrb.mxu3 %v3784_v9  ;;  %2587 = vmatpush.bf16.msra.mxu0 %v3944_v57  ;;  %v4565_v9 = vld [vmem:[#allocation7 + $0xe8] sm:$0xf0]  ;;  %v3728_v57 = vor.u32 %v4655_v61, %v3727_v60  ;;  %v3668_v60 = vor.u32 %v4640_v51, %v3667_v50  ;;  %v3767_v50 = vld [vmem:[#allocation7 + $0x3f8] sm:$0xf] }
 0x155   :  { %v4665_v51 = vld [vmem:[#allocation7 + $0x408] sm:$0xf0] }
 0x156   :  { %2600 = vmatpush.bf16.msra.mxu1 %v4124_v12  ;;  %2614 = vmatpush.bf16.msra.mxu2 %v4284_v13  ;;  %v4605_v12 = vld [vmem:[#allocation7 + $0x228] sm:$0xf0]  ;;  %v3707_v13 = vld [vmem:[#allocation7 + $0x380] sm:$0xf] }
 0x157   :  { %v3708_v26 = vor.u32 %v4650_v14, %v3707_v13  ;;  %v4545_v13 = vld [vmem:[#allocation7 + $0x48] sm:$0xf0] }
 0x158   :  { %2574 = vmatpush.bf16.msrb.mxu3 %v3764_v22  ;;  %2588 = vmatpush.bf16.msra.mxu0 %v3924_v23  ;;  %v3368_v22 = vor.u32 %v4565_v9, %v3367_v8  ;;  %v3528_v23 = vor.u32 %v4605_v12, %v3527_v11  ;;  %v3807_v8 = vld [vmem:[#allocation7 + $0x448] sm:$0xf]  ;;  %v4675_v9 = vld [vmem:[#allocation7 + $0x458] sm:$0xf0]  ;;  %v3468_v11 = vor.u32 %v4590_v63, %v3467_v62  ;;  %v3287_v12 = vld [vmem:[#allocation7 + $0x38] sm:$0xf] }
 0x15a   :  { %2601 = vmatpush.bf16.msra.mxu1 %v4104_v27  ;;  %2615 = vmatpush.bf16.msra.mxu2 %v4264_v28  ;;  %v3868_v27 = vor.u32 %v4690_v16, %v3867_v15  ;;  %v3507_v28 = vld [vmem:[#allocation7 + $0x1f0] sm:$0xf]  ;;  %v3808_v15 = vor.u32 %v4675_v9, %v3807_v8  ;;  %v3447_v16 = vld [vmem:[#allocation7 + $0x178] sm:$0xf]  ;;  %v4770_v8 = vld [vmem:[#allocation7 + $0x750] sm:$0xf0] }
 0x15b   :  { %v3508_v38 = vor.u32 %v4600_v29, %v3507_v28  ;;  %v3267_v29 = vld [vmem:[#allocation7 + $0x10] sm:$0xf] }
 0x15c   :  { %2575 = vmatpush.bf16.msrb.mxu3 %v3744_v43  ;;  %2589 = vmatpush.bf16.msra.mxu0 %v3904_v44  ;;  %v4555_v43 = vld [vmem:[#allocation7 + $0x98] sm:$0xf0]  ;;  %v3688_v44 = vor.u32 %v4645_v33, %v3687_v30  ;;  %v4540_v30 = vld [vmem:[#allocation7 + $0x20] sm:$0xf0]  ;;  %v3427_v33 = vld [vmem:[#allocation7 + $0x150] sm:$0xf] }
 0x15d   :  { %v3328_v55 = vor.u32 %v4555_v43, %v3327_v39  ;;  %v4735_v39 = vld [vmem:[#allocation7 + $0x638] sm:$0xf0]  ;;  %v4207_v43 = vld [vmem:[#allocation7 + $0x768] sm:$0xf]  ;;  %v3587_v9 = vld [vmem:[#allocation7 + $0x290] sm:$0xf] }
 0x15e   :  { %2602 = vmatpush.bf16.msra.mxu1 %v4084_v53  ;;  %2616 = vmatpush.bf16.msra.mxu2 %v4244_v54  ;;  %v3827_v53 = vld [vmem:[#allocation7 + $0x470] sm:$0xf]  ;;  %v4680_v54 = vld [vmem:[#allocation7 + $0x480] sm:$0xf0] }
 0x15f   :  { %2576 = vmatmul.bf16.vlgmr.msrb.gmra.mxu3 %v5171_v21  ;;  %2590 = vmatmul.bf16.vlgmr.msra.gmra.mxu0 %v5176_v4  ;;  %v3828_v61 = vor.u32 %v4680_v54, %v3827_v53 }
 0x160   :  { %2624 = vmatpush.bf16.msra.mxu3 %v3408_v45  ;;  %2638 = vmatpush.bf16.msrb.mxu0 %v3568_v46  ;;  %v3848_v45 = vor.u32 %v4685_v35, %v3847_v34  ;;  %v3487_v46 = vld [vmem:[#allocation7 + $0x1c8] sm:$0xf] }
 0x161   :  { %v3488_v56 = vor.u32 %v4595_v47, %v3487_v46  ;;  %v5234_v46 = vpop.f32.mrf.mxu1  ;;  %v4625_v47 = vld [vmem:[#allocation7 + $0x2c8] sm:$0xf0] }
 0x162   :  { %2603 = vmatpush.bf16.msra.mxu1 %v4064_v6  ;;  %2617 = vmatpush.bf16.msra.mxu2 %v4224_v7  ;;  %v5230_v6 = vpop.f32.mrf.mxu3  ;;  %v4635_v7 = vld [vmem:[#allocation7 + $0x318] sm:$0xf0] }
 0x164   :  { %2625 = vmatpush.bf16.msra.mxu3 %v3388_v0  ;;  %2639 = vmatpush.bf16.msrb.mxu0 %v3548_v1  ;;  %v3647_v0 = vld [vmem:[#allocation7 + $0x308] sm:$0xf]  ;;  %v5228_v1 = vpop.f32.mrf.mxu0 }
 0x165   :  { %2604 = vmatmul.bf16.vlgmr.msra.gmra.mxu1 %v5178_v5  ;;  %2618 = vmatmul.bf16.vlgmr.msra.gmra.mxu2 %v5182_v32  ;;  %v3648_v14 = vor.u32 %v4635_v7, %v3647_v0  ;;  %v3768_v0 = vor.u32 %v4665_v51, %v3767_v50  ;;  %v4187_v7 = vld [vmem:[#allocation7 + $0x740] sm:$0xf]  ;;  %v4822_v50 = vld [vmem:[#allocation10 + $0x30] sm:$0xff]  ;;  %v2258_v51 = vadd.f32 %v5208_v41, %v5210_v42  ;;  %v4127_v42 = vld [vmem:[#allocation7 + $0x6c8] sm:$0xf] }
 0x166   :  { %2652 = vmatpush.bf16.msrb.mxu1 %v3728_v57  ;;  %2666 = vmatpush.bf16.msrb.mxu2 %v3888_v10  ;;  %v5232_v57 = vpop.f32.mrf.mxu2  ;;  %v3308_v10 = vor.u32 %v4550_v40, %v3307_v58 }
 0x168   :  { %2626 = vmatpush.bf16.msra.mxu3 %v3368_v22  ;;  %2640 = vmatpush.bf16.msrb.mxu0 %v3528_v23  ;;  %v4585_v22 = vld [vmem:[#allocation7 + $0x188] sm:$0xf0]  ;;  %v3627_v23 = vld [vmem:[#allocation7 + $0x2e0] sm:$0xf] }
 0x169   :  { %v3448_v28 = vor.u32 %v4585_v22, %v3447_v16  ;;  %v3628_v34 = vor.u32 %v4630_v24, %v3627_v23  ;;  %v4188_v22 = vor.u32 %v4770_v8, %v4187_v7  ;;  %v4755_v7 = vld [vmem:[#allocation7 + $0x6d8] sm:$0xf0]  ;;  %v4307_v8 = vld [vmem:[#allocation7 + $0x830] sm:$0xf] }
 0x16a   :  { %2653 = vmatpush.bf16.msrb.mxu1 %v3708_v26  ;;  %2667 = vmatpush.bf16.msrb.mxu2 %v3868_v27  ;;  %v4670_v26 = vld [vmem:[#allocation7 + $0x430] sm:$0xf0]  ;;  %v3288_v27 = vor.u32 %v4545_v13, %v3287_v12  ;;  %v2353_v54 = vpop.f32.mrf.mxu3  ;;  %v4660_v12 = vld [vmem:[#allocation7 + $0x3e0] sm:$0xf0]  ;;  %v4367_v13 = vld [vmem:[#allocation7 + $0x8a8] sm:$0xf] }
 0x16b   :  { %v3788_v35 = vor.u32 %v4670_v26, %v3787_v25  ;;  %v4007_v25 = vld [vmem:[#allocation7 + $0x5d8] sm:$0xf]  ;;  %v4725_v26 = vld [vmem:[#allocation7 + $0x5e8] sm:$0xf0] }
 0x16c   :  { %2627 = vmatpush.bf16.msra.mxu3 %v3348_v37  ;;  %2641 = vmatpush.bf16.msrb.mxu0 %v3508_v38  ;;  %v4580_v37 = vld [vmem:[#allocation7 + $0x160] sm:$0xf0]  ;;  %v4047_v38 = vld [vmem:[#allocation7 + $0x628] sm:$0xf]  ;;  %v2367_v53 = vpop.f32.mrf.mxu0 }
 0x16d   :  { %v4048_v58 = vor.u32 %v4735_v39, %v4047_v38 }
 0x16e   :  { %2654 = vmatpush.bf16.msrb.mxu1 %v3688_v44  ;;  %2668 = vmatpush.bf16.msrb.mxu2 %v3848_v45  ;;  %v4775_v44 = vld [vmem:[#allocation7 + $0x778] sm:$0xf0]  ;;  %v3607_v45 = vld [vmem:[#allocation7 + $0x2b8] sm:$0xf]  ;;  %v2341_v62 = vpop.f32.mrf.mxu2 }
 0x16f   :  { %v4208_v40 = vor.u32 %v4775_v44, %v4207_v43  ;;  %v3608_v63 = vor.u32 %v4625_v47, %v3607_v45  ;;  %v4008_v43 = vor.u32 %v4725_v26, %v4007_v25  ;;  %v4147_v45 = vld [vmem:[#allocation7 + $0x6f0] sm:$0xf]  ;;  %v4760_v47 = vld [vmem:[#allocation7 + $0x700] sm:$0xf0]  ;;  %v4750_v25 = vld [vmem:[#allocation7 + $0x6b0] sm:$0xf0] }
 0x170   :  { %2628 = vmatpush.bf16.msra.mxu3 %v3328_v55  ;;  %2642 = vmatpush.bf16.msrb.mxu0 %v3488_v56  ;;  %v3268_v55 = vor.u32 %v4540_v30, %v3267_v29  ;;  %v3428_v56 = vor.u32 %v4580_v37, %v3427_v33  ;;  %v4167_v29 = vld [vmem:[#allocation7 + $0x718] sm:$0xf]  ;;  %v4823_v30 = vld [vmem:[#allocation10 + $0x38] sm:$0xff]  ;;  %v2381_v37 = vpop.f32.mrf.mxu1  ;;  %v4820_v26 = vld [vmem:[#allocation10 + $0x20] sm:$0xff] }
 0x171   :  { %v4347_v33 = vld [vmem:[#allocation7 + $0x880] sm:$0xf] }
 0x172   :  { %2655 = vmatpush.bf16.msrb.mxu1 %v3668_v60  ;;  %2669 = vmatpush.bf16.msrb.mxu2 %v3828_v61  ;;  %v4027_v60 = vld [vmem:[#allocation7 + $0x600] sm:$0xf]  ;;  %v4730_v61 = vld [vmem:[#allocation7 + $0x610] sm:$0xf0]  ;;  %v2355_v39 = vpop.f32.mrf.mxu3 }
 0x173   :  { %v4028_v16 = vor.u32 %v4730_v61, %v4027_v60  ;;  %v4148_v60 = vor.u32 %v4760_v47, %v4147_v45  ;;  %v3967_v61 = vld [vmem:[#allocation7 + $0x588] sm:$0xf] }
 0x174   :  { %2629 = vmatpush.bf16.msra.mxu3 %v3308_v10  ;;  %2643 = vmatpush.bf16.msrb.mxu0 %v3468_v11  ;;  %v4620_v10 = vld [vmem:[#allocation7 + $0x2a0] sm:$0xf0]  ;;  %v3747_v11 = vld [vmem:[#allocation7 + $0x3d0] sm:$0xf]  ;;  %v2369_v38 = vpop.f32.mrf.mxu0 }
 0x175   :  { %v3588_v23 = vor.u32 %v4620_v10, %v3587_v9  ;;  %v3748_v24 = vor.u32 %v4660_v12, %v3747_v11 }
 0x176   :  { %2656 = vmatpush.bf16.msrb.mxu1 %v3648_v14  ;;  %2670 = vmatpush.bf16.msrb.mxu2 %v3808_v15  ;;  %v4815_v14 = vld [vmem:[#allocation7 + $0x8b8] sm:$0xf0]  ;;  %v2354_v15 = vadd.f32 %v2353_v54, %v5232_v57  ;;  %v4765_v57 = vld [vmem:[#allocation7 + $0x728] sm:$0xf0]  ;;  %v4327_v54 = vld [vmem:[#allocation7 + $0x858] sm:$0xf] }
 0x178   :  { %2630 = vmatpush.bf16.msra.mxu3 %v3288_v27  ;;  %2644 = vmatpush.bf16.msrb.mxu0 %v3448_v28  ;;  %v2256_v27 = vadd.f32 %v5202_v2, %v5204_v3  ;;  %v4368_v28 = vor.u32 %v4815_v14, %v4367_v13  ;;  %v4168_v2 = vor.u32 %v4765_v57, %v4167_v29  ;;  %v3987_v3 = vld [vmem:[#allocation7 + $0x5b0] sm:$0xf] }
 0x179   :  { %v4128_v13 = vor.u32 %v4755_v7, %v4127_v42  ;;  %v2731_v14 = vld [vmem:[#allocation1] sm:$0xff] }
 0x17a   :  { %2657 = vmatpush.bf16.msrb.mxu1 %v3628_v34  ;;  %2671 = vmatpush.bf16.msrb.mxu2 %v3788_v35  ;;  %v4810_v34 = vld [vmem:[#allocation7 + $0x890] sm:$0xf0]  ;;  %v2368_v35 = vadd.f32 %v2367_v53, %v2354_v15  ;;  %v2395_v53 = vpop.f32.mrf.mxu2  ;;  %v3947_v15 = vld [vmem:[#allocation7 + $0x560] sm:$0xf] }
 0x17b   :  { %v4348_v44 = vor.u32 %v4810_v34, %v4347_v33  ;;  %v2736_v33 = vpack.i.b16 %v2731_v14, %v2731_v14 }
 0x17c   :  { %2631 = vmatpush.bf16.msra.mxu3 %v3268_v55  ;;  %2645 = vmatpush.bf16.msrb.mxu0 %v3428_v56  ;;  %v4805_v55 = vld [vmem:[#allocation7 + $0x868] sm:$0xf0]  ;;  %v2423_v11 = vpop.f32.mrf.mxu0 }
 0x17d   :  { %v4328_v41 = vor.u32 %v4805_v55, %v4327_v54  ;;  %v4700_v55 = vld [vmem:[#allocation7 + $0x520] sm:$0xf0] }
 0x17e   :  { %2658 = vmatpush.bf16.msrb.mxu1 %v3608_v63  ;;  %2672 = vmatpush.bf16.msrb.mxu2 %v3768_v0  ;;  %v4715_v63 = vld [vmem:[#allocation7 + $0x598] sm:$0xf0] }
 0x17f   :  { %2632 = vmatmul.bf16.vlgmr.msra.gmra.mxu3 %v5155_v48  ;;  %2646 = vmatmul.bf16.vlgmr.msrb.gmra.mxu0 %v5157_v49  ;;  %v4720_v48 = vld [vmem:[#allocation7 + $0x5c0] sm:$0xf0]  ;;  %v2270_v49 = vadd.f32 %v5206_v36, %v2256_v27  ;;  %v3968_v12 = vor.u32 %v4715_v63, %v3967_v61  ;;  %v2383_v27 = vpop.f32.mrf.mxu1  ;;  %v4785_v63 = vld [vmem:[#allocation7 + $0x7c8] sm:$0xf0] }
 0x180   :  { %2680 = vmatpush.bf16.msrb.mxu3 %v4048_v58  ;;  %2694 = vmatpush.bf16.msra.mxu0 %v4208_v40  ;;  %v2382_v58 = vadd.f32 %v2381_v37, %v2368_v35  ;;  %v2356_v40 = vadd.f32 %v2355_v39, %v2341_v62  ;;  %v3988_v36 = vor.u32 %v4720_v48, %v3987_v3  ;;  %v3927_v37 = vld [vmem:[#allocation7 + $0x538] sm:$0xf]  ;;  %v4745_v3 = vld [vmem:[#allocation7 + $0x688] sm:$0xf0]  ;;  %v4819_v48 = vld [vmem:[#allocation10 + $0x18] sm:$0xff] }
 0x181   :  { %v2284_v56 = vadd.f32 %v5212_v52, %v2270_v49  ;;  %v4821_v52 = vld [vmem:[#allocation10 + $0x28] sm:$0xff]  ;;  %v2272_v62 = vadd.f32 %v5216_v17, %v2258_v51  ;;  %v4267_v49 = vld [vmem:[#allocation7 + $0x7e0] sm:$0xf] }
 0x182   :  { %2659 = vmatpush.bf16.msrb.mxu1 %v3588_v23  ;;  %2673 = vmatpush.bf16.msrb.mxu2 %v3748_v24  ;;  %v2396_v9 = vadd.f32 %v2395_v53, %v2382_v58  ;;  %v4107_v24 = vld [vmem:[#allocation7 + $0x6a0] sm:$0xf]  ;;  %v2397_v34 = vpop.f32.mrf.mxu2 }
 0x183   :  { %v2298_v0 = vadd.f32 %v5220_v19, %v2284_v56  ;;  %v2286_v10 = vadd.f32 %v5222_v31, %v2272_v62  ;;  %v2409_v19 = vpop.f32.mrf.mxu3  ;;  %v4287_v31 = vld [vmem:[#allocation7 + $0x808] sm:$0xf] }
 0x184   :  { %2681 = vmatpush.bf16.msrb.mxu3 %v4028_v16  ;;  %2695 = vmatpush.bf16.msra.mxu0 %v4188_v22  ;;  %v4710_v16 = vld [vmem:[#allocation7 + $0x570] sm:$0xf0]  ;;  %v2410_v23 = vadd.f32 %v2409_v19, %v2396_v9  ;;  %v2425_v61 = vpop.f32.mrf.mxu0 }
 0x185   :  { %2660 = vmatmul.bf16.vlgmr.msrb.gmra.mxu1 %v5169_v20  ;;  %2674 = vmatmul.bf16.vlgmr.msrb.gmra.mxu2 %v5171_v21  ;;  %v4800_v20 = vld [vmem:[#allocation7 + $0x840] sm:$0xf0]  ;;  %v2370_v21 = vadd.f32 %v2369_v38, %v2356_v40  ;;  %v2312_v22 = vadd.f32 %v5218_v18, %v2298_v0  ;;  %v2300_v29 = vadd.f32 %v5230_v6, %v2286_v10  ;;  %v4705_v38 = vld [vmem:[#allocation7 + $0x548] sm:$0xf0]  ;;  %v4790_v6 = vld [vmem:[#allocation7 + $0x7f0] sm:$0xf0] }
 0x186   :  { %2708 = vmatpush.bf16.msra.mxu1 %v4368_v28  ;;  %3131 = vmatpush.bf16.msra.mxu2 %v4823_v30  ;;  %v4308_v17 = vor.u32 %v4800_v20, %v4307_v8  ;;  %v4795_v28 = vld [vmem:[#allocation7 + $0x818] sm:$0xf0]  ;;  %v2424_v30 = vadd.f32 %v2423_v11, %v2410_v23  ;;  %v3948_v35 = vor.u32 %v4710_v16, %v3947_v15  ;;  %v4067_v40 = vld [vmem:[#allocation7 + $0x650] sm:$0xf]  ;;  %v4780_v11 = vld [vmem:[#allocation7 + $0x7a0] sm:$0xf0] }
 0x187   :  { %v2384_v57 = vadd.f32 %v2383_v27, %v2370_v21  ;;  %v4108_v18 = vor.u32 %v4750_v25, %v4107_v24  ;;  %v2326_v39 = vadd.f32 %v5226_v59, %v2312_v22  ;;  %v3928_v51 = vor.u32 %v4705_v38, %v3927_v37  ;;  %v3907_v59 = vld [vmem:[#allocation7 + $0x510] sm:$0xf]  ;;  %v4831_v20 = vld [vmem:[#allocation10 + $0x78] sm:$0xff]  ;;  %v4830_v19 = vld [vmem:[#allocation10 + $0x70] sm:$0xff] }
 0x188   :  { %2682 = vmatpush.bf16.msrb.mxu3 %v4008_v43  ;;  %2696 = vmatpush.bf16.msra.mxu0 %v4168_v2  ;;  %v4288_v43 = vor.u32 %v4795_v28, %v4287_v31  ;;  %v4087_v2 = vld [vmem:[#allocation7 + $0x678] sm:$0xf]  ;;  %v4268_v58 = vor.u32 %v4790_v6, %v4267_v49  ;;  %v4817_v21 = vld [vmem:[#allocation10 + $0x8] sm:$0xff]  ;;  %v4816_v15 = vld [vmem:[#allocation10] sm:$0xff] }
 0x189   :  { %v2398_v45 = vadd.f32 %v2397_v34, %v2384_v57  ;;  %v5254_v47 = vpack.c.bf16 %v2424_v30, %v2326_v39  ;;  %v4088_v53 = vor.u32 %v4745_v3, %v4087_v2  ;;  %v4227_v10 = vld [vmem:[#allocation7 + $0x790] sm:$0xf]  ;;  %v2732_v24 = vld [vmem:[#allocation1 + $0x9] sm:$0xff]  ;;  %v4828_v25 = vld [vmem:[#allocation10 + $0x60] sm:$0xff]  ;;  %v2437_v30 = vpop.f32.mrf.mxu1 }
 0x18a   :  { %2709 = vmatpush.bf16.msra.mxu1 %v4348_v44  ;;  %3132 = vmatpush.bf16.msra.mxu2 %v4822_v50  ;;  %v2314_v44 = vadd.f32 %v5228_v1, %v2300_v29  ;;  %v2738_v50 = vperm.slane %v2736_v33, 0  ;;  %v4247_v1 = vld [vmem:[#allocation7 + $0x7b8] sm:$0xf]  ;;  %v4228_v14 = vor.u32 %v4780_v11, %v4227_v10  ;;  %v4829_v23 = vld [vmem:[#allocation10 + $0x68] sm:$0xff]  ;;  %v4827_v27 = vld [vmem:[#allocation10 + $0x58] sm:$0xff] }
 0x18b   :  { %v2411_v54 = vpop.f32.mrf.mxu3  ;;  %v4248_v9 = vor.u32 %v4785_v63, %v4247_v1  ;;  %v4826_v28 = vld [vmem:[#allocation10 + $0x50] sm:$0xff]  ;;  %v4825_v57 = vld [vmem:[#allocation10 + $0x48] sm:$0xff]  ;;  %v4839_v2 = vld [vmem:[#allocation10 + $0xb8] sm:$0xff] }
 0x18c   :  { %2683 = vmatpush.bf16.msrb.mxu3 %v3988_v36  ;;  %2697 = vmatpush.bf16.msra.mxu0 %v4148_v60  ;;  %v2412_v56 = vadd.f32 %v2411_v54, %v2398_v45  ;;  %v4740_v36 = vld [vmem:[#allocation7 + $0x660] sm:$0xf0]  ;;  %v4818_v60 = vld [vmem:[#allocation10 + $0x10] sm:$0xff]  ;;  %v2328_v0 = vadd.f32 %v5234_v46, %v2314_v44  ;;  %v2761_v42 = vunpack.c.l.bf16 %v2738_v50  ;;  %v4837_v50 = vld [vmem:[#allocation10 + $0xa8] sm:$0xff] }
 0x18d   :  { %v4068_v62 = vor.u32 %v4740_v36, %v4067_v40  ;;  %v4847_v3 = vld [vmem:[#allocation10 + $0xf8] sm:$0xff]  ;;  %v4838_v44 = vld [vmem:[#allocation10 + $0xb0] sm:$0xff] }
 0x18e   :  { %2710 = vmatpush.bf16.msra.mxu1 %v4328_v41  ;;  %3133 = vmatpush.bf16.msra.mxu2 %v4821_v52  ;;  %v2751_v41 = vunpack.c.l.bf16 %v5254_v47  ;;  %v2426_v7 = vadd.f32 %v2425_v61, %v2412_v56  ;;  %v3908_v52 = vor.u32 %v4700_v55, %v3907_v59  ;;  %v4846_v45 = vld [vmem:[#allocation10 + $0xf0] sm:$0xff]  ;;  %v4836_v55 = vld [vmem:[#allocation10 + $0xa0] sm:$0xff]  ;;  %v4835_v40 = vld [vmem:[#allocation10 + $0x98] sm:$0xff] }
 0x18f   :  { %v4844_v56 = vld [vmem:[#allocation10 + $0xe0] sm:$0xff]  ;;  %v4843_v36 = vld [vmem:[#allocation10 + $0xd8] sm:$0xff]  ;;  %v4834_v63 = vld [vmem:[#allocation10 + $0x90] sm:$0xff] }
 0x190   :  { %2684 = vmatpush.bf16.msrb.mxu3 %v3968_v12  ;;  %2698 = vmatpush.bf16.msra.mxu0 %v4128_v13  ;;  %v2725_v8 = vpack.c.bf16 %v2426_v7, %v2328_v0  ;;  %v2766_v12 = vadd.f32 %v2761_v42, %v2751_v41  ;;  %v4842_v0 = vld [vmem:[#allocation10 + $0xd0] sm:$0xff]  ;;  %v4841_v7 = vld [vmem:[#allocation10 + $0xc8] sm:$0xff] }
 0x191   :  { %v2439_v39 = vpop.f32.mrf.mxu1 }
 0x192   :  { %2711 = vmatpush.bf16.msra.mxu1 %v4308_v17  ;;  %3134 = vmatpush.bf16.msra.mxu2 %v4820_v26  ;;  %v2756_v13 = vunpack.c.l.bf16 %v2725_v8  ;;  %v2792_v16 = vmax.f32 %v2766_v12, 0.0  ;;  %v2739_v26 = vpack.i.b16 %v2732_v24, %v2732_v24 }
 0x194   :  { %2685 = vmatpush.bf16.msrb.mxu3 %v3948_v35  ;;  %2699 = vmatpush.bf16.msra.mxu0 %v4108_v18  ;;  %v2771_v46 = vadd.f32 %v2761_v42, %v2756_v13  ;;  %v2741_v31 = vperm.slane %v2739_v26, 0  ;;  %v2451_v35 = vpop.f32.mrf.mxu2  ;;  %v4833_v42 = vld [vmem:[#allocation10 + $0x88] sm:$0xff] }
 0x196   :  { %2712 = vmatpush.bf16.msra.mxu1 %v4288_v43  ;;  %3135 = vmatpush.bf16.msra.mxu2 %v4819_v48  ;;  %v2797_v22 = vmax.f32 %v2771_v46, 0.0  ;;  %v2762_v29 = vunpack.c.l.bf16 %v2741_v31 }
 0x198   :  { %2686 = vmatpush.bf16.msrb.mxu3 %v3928_v51  ;;  %2700 = vmatpush.bf16.msra.mxu0 %v4088_v53  ;;  %v2802_v17 = vpack.c.bf16 %v2797_v22, %v2792_v16  ;;  %v4845_v51 = vld [vmem:[#allocation10 + $0xe8] sm:$0xff] }
 0x19a   :  { %2713 = vmatpush.bf16.msra.mxu1 %v4268_v58  ;;  %3136 = vmatpush.bf16.msra.mxu2 %v4818_v60 }
 0x19c   :  { %2687 = vmatpush.bf16.msrb.mxu3 %v3908_v52  ;;  %2701 = vmatpush.bf16.msra.mxu0 %v4068_v62  ;;  %v2453_v43 = vpop.f32.mrf.mxu2  ;;  %v2479_v48 = vpop.f32.mrf.mxu0 }
 0x19d   :  { %v2454_v12 = vadd.f32 %v2453_v43, %v2439_v39 }
 0x19e   :  { %2714 = vmatpush.bf16.msra.mxu1 %v4248_v9  ;;  %3137 = vmatpush.bf16.msra.mxu2 %v4817_v21  ;;  %v2452_v9 = vadd.f32 %v2451_v35, %v2437_v30 }
 0x19f   :  { %2688 = vmatmul.bf16.vlgmr.msrb.gmra.mxu3 %v5176_v4  ;;  %2702 = vmatmul.bf16.vlgmr.msra.gmra.mxu0 %v5178_v5  ;;  %v2757_v4 = vunpack.c.h.bf16 %v2725_v8  ;;  %v2752_v5 = vunpack.c.h.bf16 %v5254_v47  ;;  %v4832_v8 = vld [vmem:[#allocation10 + $0x80] sm:$0xff] }
 0x1a0   :  { %3145 = vmatpush.bf16.msra.mxu3 %v4831_v20  ;;  %3159 = vmatpush.bf16.msrb.mxu0 %v4839_v2  ;;  %v4840_v20 = vld [vmem:[#allocation10 + $0xc0] sm:$0xff] }
 0x1a1   :  { %v2772_v33 = vadd.f32 %v2762_v29, %v2757_v4  ;;  %v2767_v34 = vadd.f32 %v2762_v29, %v2752_v5 }
 0x1a2   :  { %2715 = vmatpush.bf16.msra.mxu1 %v4228_v14  ;;  %3138 = vmatpush.bf16.msra.mxu2 %v4816_v15  ;;  %v2465_v49 = vpop.f32.mrf.mxu3  ;;  %v2493_v6 = vpop.f32.mrf.mxu1 }
 0x1a3   :  { %v2798_v18 = vmax.f32 %v2772_v33, 0.0  ;;  %v2793_v37 = vmax.f32 %v2767_v34, 0.0  ;;  %v2466_v10 = vadd.f32 %v2465_v49, %v2452_v9 }
 0x1a4   :  { %3146 = vmatpush.bf16.msra.mxu3 %v4830_v19  ;;  %3160 = vmatpush.bf16.msrb.mxu0 %v4838_v44  ;;  %v2481_v53 = vpop.f32.mrf.mxu0 }
 0x1a5   :  { %2716 = vmatmul.bf16.vlgmr.msra.gmra.mxu1 %v5182_v32  ;;  %3139 = vmatmul.bf16.vlgmr.msra.gmra.mxu2 %v2802_v17  ;;  %v4824_v32 = vld [vmem:[#allocation10 + $0x40] sm:$0xff]  ;;  %v2803_v38 = vpack.c.bf16 %v2798_v18, %v2793_v37  ;;  %v2480_v46 = vadd.f32 %v2479_v48, %v2466_v10 }
 0x1a6   :  { %3173 = vmatpush.bf16.msrb.mxu1 %v4847_v3 }
 0x1a7   :  { %v2494_v17 = vadd.f32 %v2493_v6, %v2480_v46 }
 0x1a8   :  { %3147 = vmatpush.bf16.msra.mxu3 %v4829_v23  ;;  %v2507_v47 = vpop.f32.mrf.mxu2  ;;  %3161 = vmatpush.bf16.msrb.mxu0 %v4837_v50 }
 0x1a9   :  { %v2508_v29 = vadd.f32 %v2507_v47, %v2494_v17 }
 0x1aa   :  { %3174 = vmatpush.bf16.msrb.mxu1 %v4846_v45  ;;  %v2467_v54 = vpop.f32.mrf.mxu3  ;;  %v2495_v59 = vpop.f32.mrf.mxu1 }
 0x1ab   :  { %v2468_v14 = vadd.f32 %v2467_v54, %v2454_v12  ;;  %v4848_v12 = vld [vmem:[#allocation10 + $0x100] sm:$0xff] }
 0x1ac   :  { %3148 = vmatpush.bf16.msra.mxu3 %v4828_v25  ;;  %3162 = vmatpush.bf16.msrb.mxu0 %v4836_v55  ;;  %v2733_v25 = vld [vmem:[#allocation1 + $0x12] sm:$0xff] }
 0x1ad   :  { %v2482_v26 = vadd.f32 %v2481_v53, %v2468_v14  ;;  %v2742_v5 = vpack.i.b16 %v2733_v25, %v2733_v25 }
 0x1ae   :  { %3175 = vmatpush.bf16.msrb.mxu1 %v4845_v51 }
 0x1af   :  { %v2496_v34 = vadd.f32 %v2495_v59, %v2482_v26 }
 0x1b0   :  { %3149 = vmatpush.bf16.msra.mxu3 %v4827_v27  ;;  %v2509_v58 = vpop.f32.mrf.mxu2  ;;  %3163 = vmatpush.bf16.msrb.mxu0 %v4835_v40  ;;  %v2734_v27 = vld [vmem:[#allocation1 + $0x1b] sm:$0xff] }
 0x1b1   :  { %v2745_v33 = vpack.i.b16 %v2734_v27, %v2734_v27  ;;  %v2510_v3 = vadd.f32 %v2509_v58, %v2496_v34  ;;  %v2735_v27 = vld [vmem:[#allocation1 + $0x24] sm:$0xff] }
 0x1b2   :  { %3176 = vmatpush.bf16.msrb.mxu1 %v4844_v56 }
 0x1b3   :  { %v2747_v43 = vperm.slane %v2745_v33, 0 }
 0x1b4   :  { %3150 = vmatpush.bf16.msra.mxu3 %v4826_v28  ;;  %3164 = vmatpush.bf16.msrb.mxu0 %v4834_v63 }
 0x1b5   :  { %v2764_v51 = vunpack.c.l.bf16 %v2747_v43 }
 0x1b6   :  { %3177 = vmatpush.bf16.msrb.mxu1 %v4843_v36  ;;  %v4855_v36 = vld [vmem:[#allocation10 + $0x138] sm:$0xff] }
 0x1b7   :  { %3187 = vmatpush.bf16.msrb.mxu2 %v4855_v36 }
 0x1b8   :  { %3151 = vmatpush.bf16.msra.mxu3 %v4825_v57  ;;  %3165 = vmatpush.bf16.msrb.mxu0 %v4833_v42 }
 0x1ba   :  { %3178 = vmatpush.bf16.msrb.mxu1 %v4842_v0 }
 0x1bc   :  { %3152 = vmatpush.bf16.msra.mxu3 %v4824_v32  ;;  %v2535_v60 = vpop.f32.mrf.mxu0  ;;  %3166 = vmatpush.bf16.msrb.mxu0 %v4832_v8  ;;  %v4851_v8 = vld [vmem:[#allocation10 + $0x118] sm:$0xff] }
 0x1be   :  { %3179 = vmatpush.bf16.msrb.mxu1 %v4841_v7 }
 0x1bf   :  { %3153 = vmatmul.bf16.vlgmr.msra.gmra.mxu3 %v2803_v38  ;;  %v2744_v38 = vperm.slane %v2742_v5, 0 }
 0x1c1   :  { %v2763_v44 = vunpack.c.l.bf16 %v2744_v38 }
 0x1c2   :  { %v2521_v61 = vpop.f32.mrf.mxu3  ;;  %v2549_v1 = vpop.f32.mrf.mxu1  ;;  %3180 = vmatpush.bf16.msrb.mxu1 %v4840_v20  ;;  %v4850_v20 = vld [vmem:[#allocation10 + $0x110] sm:$0xff] }
 0x1c3   :  { %v2550_v11 = vadd.f32 %v2549_v1, %v2535_v60  ;;  %v2522_v35 = vadd.f32 %v2521_v61, %v2508_v29  ;;  %v4854_v1 = vld [vmem:[#allocation10 + $0x130] sm:$0xff]  ;;  %v2748_v29 = vpack.i.b16 %v2735_v27, %v2735_v27 }
 0x1c4   :  { %v2537_v52 = vpop.f32.mrf.mxu0  ;;  %3188 = vmatpush.bf16.msrb.mxu2 %v4854_v1 }
 0x1c5   :  { %v2750_v34 = vperm.slane %v2748_v29, 0 }
 0x1c8   :  { %v2563_v41 = vpop.f32.mrf.mxu2 }
 0x1c9   :  { %v2564_v19 = vadd.f32 %v2563_v41, %v2550_v11  ;;  %v4849_v11 = vld [vmem:[#allocation10 + $0x108] sm:$0xff] }
 0x1ca   :  { %v2523_v62 = vpop.f32.mrf.mxu3  ;;  %v2551_v21 = vpop.f32.mrf.mxu1 }
 0x1cb   :  { %v2552_v31 = vadd.f32 %v2551_v21, %v2537_v52  ;;  %v2524_v6 = vadd.f32 %v2523_v62, %v2510_v3  ;;  %v4853_v52 = vld [vmem:[#allocation10 + $0x128] sm:$0xff]  ;;  %v4852_v62 = vld [vmem:[#allocation10 + $0x120] sm:$0xff] }
 0x1cc   :  { %3189 = vmatpush.bf16.msrb.mxu2 %v4853_v52 }
 0x1d0   :  { %v2565_v13 = vpop.f32.mrf.mxu2  ;;  %3190 = vmatpush.bf16.msrb.mxu2 %v4852_v62 }
 0x1d1   :  { %v2566_v57 = vadd.f32 %v2565_v13, %v2552_v31 }
 0x1d4   :  { %3191 = vmatpush.bf16.msrb.mxu2 %v4851_v8 }
 0x1d8   :  { %3192 = vmatpush.bf16.msrb.mxu2 %v4850_v20 }
 0x1dc   :  { %v2591_v15 = vpop.f32.mrf.mxu0  ;;  %3193 = vmatpush.bf16.msrb.mxu2 %v4849_v11 }
 0x1e0   :  { %3194 = vmatpush.bf16.msrb.mxu2 %v4848_v12 }
 0x1e2   :  { %v2577_v16 = vpop.f32.mrf.mxu3  ;;  %v2605_v23 = vpop.f32.mrf.mxu1 }
 0x1e3   :  { %v2578_v22 = vadd.f32 %v2577_v16, %v2564_v19 }
 0x1e4   :  { %v2593_v37 = vpop.f32.mrf.mxu0 }
 0x1e5   :  { %v2592_v24 = vadd.f32 %v2591_v15, %v2578_v22 }
 0x1e7   :  { %v2606_v28 = vadd.f32 %v2605_v23, %v2592_v24 }
 0x1e8   :  { %v2619_v4 = vpop.f32.mrf.mxu2 }
 0x1e9   :  { %v2620_v30 = vadd.f32 %v2619_v4, %v2606_v28 }
 0x1ea   :  { %v2579_v32 = vpop.f32.mrf.mxu3  ;;  %v2607_v48 = vpop.f32.mrf.mxu1 }
 0x1eb   :  { %v2580_v18 = vadd.f32 %v2579_v32, %v2566_v57  ;;  %v2723_v39 = vpack.c.bf16 %v2620_v30, %v2522_v35 }
 0x1ed   :  { %v2594_v2 = vadd.f32 %v2593_v37, %v2580_v18  ;;  %v2753_v50 = vunpack.c.l.bf16 %v2723_v39  ;;  %v2754_v47 = vunpack.c.h.bf16 %v2723_v39  ;;  %v2765_v39 = vunpack.c.l.bf16 %v2750_v34 }
 0x1ef   :  { %v2608_v49 = vadd.f32 %v2607_v48, %v2594_v2  ;;  %v2768_v59 = vadd.f32 %v2763_v44, %v2753_v50  ;;  %v2769_v55 = vadd.f32 %v2764_v51, %v2754_v47  ;;  %v4871_v47 = vld [vmem:[#allocation12] ss:$0 sm:$0xff] }
 0x1f0   :  { %v2621_v45 = vpop.f32.mrf.mxu2 }
 0x1f1   :  { %v2622_v53 = vadd.f32 %v2621_v45, %v2608_v49  ;;  %v2794_v58 = vmax.f32 %v2768_v59, 0.0  ;;  %v2795_v63 = vmax.f32 %v2769_v55, 0.0 }
 0x1f3   :  { %v2726_v54 = vpack.c.bf16 %v2622_v53, %v2524_v6 }
 0x1f5   :  { %v2758_v56 = vunpack.c.l.bf16 %v2726_v54  ;;  %v2759_v40 = vunpack.c.h.bf16 %v2726_v54 }
 0x1f7   :  { %v2773_v60 = vadd.f32 %v2763_v44, %v2758_v56  ;;  %v2774_v61 = vadd.f32 %v2764_v51, %v2759_v40 }
 0x1f9   :  { %v2799_v0 = vmax.f32 %v2773_v60, 0.0  ;;  %v2800_v41 = vmax.f32 %v2774_v61, 0.0 }
 0x1fb   :  { %v2804_v42 = vpack.c.bf16 %v2799_v0, %v2794_v58  ;;  %v2805_v7 = vpack.c.bf16 %v2800_v41, %v2795_v63 }
 0x1fc   :  { %v2647_v9 = vpop.f32.mrf.mxu0 }
 0x1fd   :  { %3167 = vmatmul.bf16.vlgmr.msrb.gmra.mxu0 %v2804_v42  ;;  %3181 = vmatmul.bf16.vlgmr.msrb.gmra.mxu1 %v2805_v7 }
 0x202   :  { %v2633_v21 = vpop.f32.mrf.mxu3  ;;  %v2661_v10 = vpop.f32.mrf.mxu1 }
 0x203   :  { %v2648_v19 = vadd.f32 %v2647_v9, %v2633_v21 }
 0x204   :  { %v2649_v13 = vpop.f32.mrf.mxu0 }
 0x205   :  { %v2662_v16 = vadd.f32 %v2661_v10, %v2648_v19 }
 0x208   :  { %v2675_v14 = vpop.f32.mrf.mxu2 }
 0x209   :  { %v2676_v22 = vadd.f32 %v2675_v14, %v2662_v16 }
 0x20a   :  { %v2635_v46 = vpop.f32.mrf.mxu3  ;;  %v2663_v15 = vpop.f32.mrf.mxu1 }
 0x20b   :  { %v2650_v24 = vadd.f32 %v2649_v13, %v2635_v46 }
 0x20d   :  { %v2664_v4 = vadd.f32 %v2663_v15, %v2650_v24 }
 0x210   :  { %v2677_v28 = vpop.f32.mrf.mxu2 }
 0x211   :  { %v2678_v57 = vadd.f32 %v2677_v28, %v2664_v4 }
 0x21c   :  { %v2703_v23 = vpop.f32.mrf.mxu0 }
 0x222   :  { %v2689_v17 = vpop.f32.mrf.mxu3  ;;  %v2717_v26 = vpop.f32.mrf.mxu1 }
 0x223   :  { %v2690_v25 = vadd.f32 %v2689_v17, %v2676_v22 }
 0x224   :  { %v2705_v35 = vpop.f32.mrf.mxu0 }
 0x225   :  { %v2704_v31 = vadd.f32 %v2703_v23, %v2690_v25 }
 0x227   :  { %v2718_v5 = vadd.f32 %v2717_v26, %v2704_v31 }
 0x228   :  { %v3140_v50 = vpop.f32.mrf.mxu2 }
 0x229   :  { %v2724_v33 = vpack.c.bf16 %v2718_v5, %v2718_v5  ;;  %v3141_v54 = vadd.f32 %v4871_v47, %v3140_v50 }
 0x22a   :  { %v2691_v30 = vpop.f32.mrf.mxu3  ;;  %v2719_v37 = vpop.f32.mrf.mxu1 }
 0x22b   :  { %v2692_v32 = vadd.f32 %v2691_v30, %v2678_v57  ;;  %v2755_v38 = vunpack.c.l.bf16 %v2724_v33 }
 0x22d   :  { %v2706_v18 = vadd.f32 %v2705_v35, %v2692_v32  ;;  %v2770_v3 = vadd.f32 %v2765_v39, %v2755_v38 }
 0x22f   :  { %v2720_v43 = vadd.f32 %v2719_v37, %v2706_v18  ;;  %v2796_v6 = vmax.f32 %v2770_v3, 0.0 }
 0x230   :  { %v3142_v59 = vpop.f32.mrf.mxu2 }
 0x231   :  { %v2727_v2 = vpack.c.bf16 %v2720_v43, %v2720_v43  ;;  %v3143_v60 = vadd.f32 %v4871_v47, %v3142_v59 }
 0x233   :  { %v2760_v48 = vunpack.c.l.bf16 %v2727_v2 }
 0x235   :  { %v2775_v49 = vadd.f32 %v2765_v39, %v2760_v48 }
 0x237   :  { %v2801_v44 = vmax.f32 %v2775_v49, 0.0 }
 0x239   :  { %v2806_v45 = vpack.c.bf16 %v2801_v44, %v2796_v6 }
 0x23b   :  { %3195 = vmatmul.bf16.vlgmr.msrb.gmra.mxu2 %v2806_v45 }
 0x242   :  { %v3154_v51 = vpop.f32.mrf.mxu3 }
 0x243   :  { %v3155_v55 = vadd.f32 %v3154_v51, %v3141_v54 }
 0x24a   :  { %v3156_v36 = vpop.f32.mrf.mxu3 }
 0x24b   :  { %v3157_v63 = vadd.f32 %v3156_v36, %v3143_v60 }
 0x27a   :  { %v3168_v53 = vpop.f32.mrf.mxu0  ;;  %v3182_v40 = vpop.f32.mrf.mxu1 }
 0x27b   :  { %v3169_v56 = vadd.f32 %v3168_v53, %v3155_v55 }
 0x27d   :  { %v3183_v61 = vadd.f32 %v3182_v40, %v3169_v56 }
 0x282   :  { %v3170_v1 = vpop.f32.mrf.mxu0  ;;  %v3184_v42 = vpop.f32.mrf.mxu1 }
 0x283   :  { %v3171_v41 = vadd.f32 %v3170_v1, %v3157_v63 }
 0x285   :  { %v3185_v7 = vadd.f32 %v3184_v42, %v3171_v41 }
 0x2be   :  { %v3196_v58 = vpop.f32.mrf.mxu2 }
 0x2bf   :  { %v3197_v0 = vadd.f32 %v3196_v58, %v3183_v61 }
 0x2c1   :  { %4872 = vtanh.f32 %v3197_v0 }
 0x2c6   :  { %v3198_v52 = vpop.f32.mrf.mxu2 }
 0x2c7   :  { %v4873_v62 = vpop.eup %4872  ;;  %v3199_v8 = vadd.f32 %v3198_v52, %v3185_v7 }
 0x2c8   :  { %3204 = vst.msk [vmem:[%s5275_s7] sm:$0xff] %vm3203_vm2, %v4873_v62 }
 0x2c9   :  { %4874 = vtanh.f32 %v3199_v8 }
 0x2cf   :  { %v4875_v20 = vpop.eup %4874 }
 0x2d0   :  { %3205 = vst.msk [vmem:[%s5275_s7 + $0x8] sm:$0xff] %vm3203_vm2, %v4875_v20 }
 0x2d1   :  { %3210 = vsyncpa [#allocation3], 1 }
 0x2d2   :  { %3211 = vsyncpa [#allocation5], 1 }
 0x2d3   :  { %3212 = vsyncpa [#allocation8], 1 }
 0x2d4   :  { %3213 = vsyncpa [#allocation11], 1 }

</bundles_post_ra>
